<compile_context>
chip_gen: v7x
topology: tpu7x:2x2x1
jax: 0.10.0
libtpu: 0.0.40
codegen_flags: <defaults>
</compile_context>

<pallas_src>
import functools
import math

import jax
import jax.numpy as jnp
import numpy as np
from jax import lax
from jax.experimental import pallas as pl
from jax.experimental.pallas import tpu as pltpu

# --- module constants (from the PyTorch source) ---
D_K = D_V = 32
D_MODEL = 128
N_HEADS = 4
D_FF = 512
N_LAYERS = 1
LN_EPS = 1e-5
MASK_FILL = -1000000000.0


# ----------------------------------------------------------------------------
# Pallas kernel: one EncoderLayer, one (param-set, batch-element, q-tile) step.
# ----------------------------------------------------------------------------
def _encoder_layer_kernel(scale_ref, x_ref, bias_ref, wfused_ref, wfc_ref,
                          w1_ref, w2_ref, *refs, with_attn, tq):
    if with_attn:
        out_ref, attn_ref, proj_ref, ctx_ref = refs
    else:
        out_ref, proj_ref, ctx_ref = refs
        attn_ref = None

    s = pl.program_id(0)       # param-set index
    qt = pl.program_id(2)      # query-row tile index

    # Fused fc0 | W_Q | W_K | W_V projection of the FULL sequence: one
    # (L,128)@(128,512) MXU matmul, computed once per (s, b) pair at qt == 0
    # and kept in VMEM scratch for all query tiles.  1/sqrt(d_k) is already
    # folded into the W_Q columns; the per-stream input scale (1.0 / 2.0) is
    # read from SMEM (scalar prefetch), so the host never duplicates x.
    @pl.when(qt == 0)
    def _():
        x = x_ref[0] * scale_ref[s]                        # (L, 128)
        proj_ref[...] = jnp.dot(x, wfused_ref[0],
                                preferred_element_type=jnp.float32)

    q0 = qt * tq
    if tq % 8 == 0:
        q0 = pl.multiple_of(q0, 8)

    residual = proj_ref[pl.ds(q0, tq), 0:D_MODEL]          # fc0(x), this tile's rows
    q = proj_ref[pl.ds(q0, tq), D_MODEL:2 * D_MODEL]       # (tq, n_heads*d_k)
    k = proj_ref[:, 2 * D_MODEL:3 * D_MODEL]               # (L,  n_heads*d_k)
    v = proj_ref[:, 3 * D_MODEL:4 * D_MODEL]               # (L,  n_heads*d_v)
    bias = bias_ref[0]                                     # (1, L) additive pad mask

    # Per-head attention; head contexts packed into the lane slices of a
    # (tq, 128) scratch so the output projection is a single K=128 matmul.
    # TODO(synk): at very large L, serialize heads (lax.fori_loop + pl.ds lane
    # slices) to bound per-head (tq, L) temporaries' live ranges.
    for h in range(N_HEADS):
        qh = q[:, h * D_K:(h + 1) * D_K]                   # (tq, d_k)
        kh = k[:, h * D_K:(h + 1) * D_K]                   # (L,  d_k)
        vh = v[:, h * D_V:(h + 1) * D_V]                   # (L,  d_v)
        # Q @ K^T without materializing a transpose of K (contraction on dim 1).
        scores = lax.dot_general(
            qh, kh, dimension_numbers=(((1,), (1,)), ((), ())),
            preferred_element_type=jnp.float32) + bias     # (tq, L)
        m = jnp.max(scores, axis=-1, keepdims=True)
        e = jnp.exp(scores - m)
        attn = e * pl.reciprocal(jnp.sum(e, axis=-1, keepdims=True), approx=True)
        if with_attn:
            attn_ref[0, 0, h] = attn.astype(attn_ref.dtype)
        ctx_ref[:, h * D_V:(h + 1) * D_V] = jnp.dot(
            attn, vh, preferred_element_type=jnp.float32)  # (tq, d_v)

    # Single fused output projection + residual.
    mha = residual + jnp.dot(ctx_ref[...], wfc_ref[0],
                             preferred_element_type=jnp.float32)

    # LayerNorm(mha_out + residual) -- residual already folded into `mha`.
    mu = jnp.mean(mha, axis=-1, keepdims=True)
    var = jnp.mean((mha - mu) ** 2, axis=-1, keepdims=True)
    y = (mha - mu) * lax.rsqrt(var + LN_EPS)

    # Position-wise FFN: Linear(128->512, no bias) -> ReLU -> Linear(512->128)
    h1 = jnp.maximum(jnp.dot(y, w1_ref[0], preferred_element_type=jnp.float32), 0.0)
    ff = jnp.dot(h1, w2_ref[0], preferred_element_type=jnp.float32)

    # LayerNorm(ff + y)
    z = ff + y
    mu2 = jnp.mean(z, axis=-1, keepdims=True)
    var2 = jnp.mean((z - mu2) ** 2, axis=-1, keepdims=True)
    out_ref[0, 0] = ((z - mu2) * lax.rsqrt(var2 + LN_EPS)).astype(out_ref.dtype)


# ----------------------------------------------------------------------------
# Wrapper: S independent EncoderLayers applied to the same batch of sequences.
# ----------------------------------------------------------------------------
def _choose_tq(L):
    """Query-row tile size: full L for short sequences, <=512 rows otherwise."""
    if L <= 512:
        return L
    for cand in (512, 256, 128, 64, 32, 16, 8):
        if L % cand == 0:
            return cand
    return L


def _vmem_cap_bytes():
    try:
        info = pltpu.get_tpu_info()
        cap = getattr(info, "vmem_capacity_bytes", None)
        if cap:
            return int(cap)
    except Exception:
        pass
    return 64 << 20   # conservative fallback (v7x physical VMEM)


def encoder_layers_pallas(x, keybias, scales, stacked_params, *,
                          attn_dtype=jnp.float32, return_attn=True, tq=None):
    """Apply S independent EncoderLayers to one batch of sequences.

    x:        (B, L, 128) f32 activations, shared across all S param sets
    keybias:  (B, 1, L)   f32 additive mask row (MASK_FILL at padded keys)
    scales:   (S,)        f32 per-param-set input scale (stream0=1.0, stream1=2.0)
    stacked_params: (w_fused (S,128,512)  [W_Q cols pre-scaled by 1/sqrt(d_k)],
                     w_fc (S,128,128), w_ffn1 (S,128,512), w_ffn2 (S,512,128))
    Returns out (S, B, L, 128) and attn (S, B, H, L, L) (or None if disabled).
    """
    B, L, D = x.shape
    assert D == D_MODEL
    wfused, wfc, w1, w2 = stacked_params
    S = wfused.shape[0]
    assert scales.shape == (S,)
    if tq is None:
        tq = _choose_tq(L)
    assert L % tq == 0
    nq = L // tq

    # --- BlockSpecs (index_maps receive the scalar-prefetch ref trailing) ---
    # TODO(synk): weights could be pipeline_mode=pl.Buffered(1) (constant along
    # the inner grid axes) to save ~1.7 MiB of duplicate VMEM.
    in_specs = [
        pl.BlockSpec((1, L, D_MODEL), lambda s, b, qt, sc: (b, 0, 0)),
        pl.BlockSpec((1, 1, L), lambda s, b, qt, sc: (b, 0, 0)),
        pl.BlockSpec((1, D_MODEL, 4 * D_MODEL), lambda s, b, qt, sc: (s, 0, 0)),
        pl.BlockSpec((1, N_HEADS * D_V, D_MODEL), lambda s, b, qt, sc: (s, 0, 0)),
        pl.BlockSpec((1, D_MODEL, D_FF), lambda s, b, qt, sc: (s, 0, 0)),
        pl.BlockSpec((1, D_FF, D_MODEL), lambda s, b, qt, sc: (s, 0, 0)),
    ]
    out_specs = [pl.BlockSpec((1, 1, tq, D_MODEL),
                              lambda s, b, qt, sc: (s, b, qt, 0))]
    out_shapes = [jax.ShapeDtypeStruct((S, B, L, D_MODEL), jnp.float32)]
    if return_attn:
        # TODO(synk): at L < 128 the attn last dim is lane-sparse; batching
        # several sequences per step would make the store lane-dense (v5e).
        out_specs.append(pl.BlockSpec((1, 1, N_HEADS, tq, L),
                                      lambda s, b, qt, sc: (s, b, 0, qt, 0)))
        out_shapes.append(jax.ShapeDtypeStruct((S, B, N_HEADS, L, L), attn_dtype))
        out_shape_arg, out_specs_arg = tuple(out_shapes), tuple(out_specs)
    else:
        out_shape_arg, out_specs_arg = out_shapes[0], out_specs[0]

    # --- VMEM budgeting (only kicks in at large L; no effect at test shapes) ---
    attn_block = (N_HEADS * tq * L * jnp.dtype(attn_dtype).itemsize) if return_attn else 0
    weight_bytes = 4 * (D_MODEL * 4 * D_MODEL + N_HEADS * D_V * D_MODEL
                        + D_MODEL * D_FF + D_FF * D_MODEL)
    vmem_est = (2 * L * D_MODEL * 4            # x block (double buffered)
                + 2 * weight_bytes             # weights (double buffered)
                + 2 * tq * D_MODEL * 4         # out block
                + 2 * attn_block               # attn block (double buffered)
                + L * 4 * D_MODEL * 4          # fused-projection scratch
                + tq * N_HEADS * D_V * 4       # context scratch
                + 10 * tq * L * 4              # per-head scores / exp temporaries
                + 2 * tq * D_FF * 4            # FFN hidden
                + (6 << 20))                   # headroom
    compiler_kwargs = dict(dimension_semantics=("parallel", "parallel", "arbitrary"))
    if vmem_est > (32 << 20):
        cap = _vmem_cap_bytes() - (8 << 20)    # per-chip cap minus headroom
        compiler_kwargs["vmem_limit_bytes"] = int(max(min(vmem_est, cap), 32 << 20))
    compiler_params = pltpu.CompilerParams(**compiler_kwargs)

    kernel = functools.partial(_encoder_layer_kernel, with_attn=return_attn, tq=tq)
    results = pl.pallas_call(
        kernel,
        out_shape=out_shape_arg,
        grid_spec=pltpu.PrefetchScalarGridSpec(
            num_scalar_prefetch=1,
            grid=(S, B, nq),
            in_specs=in_specs,
            out_specs=out_specs_arg,
            scratch_shapes=[
                pltpu.VMEM((L, 4 * D_MODEL), jnp.float32),      # fc0|Q|K|V of full seq
                pltpu.VMEM((tq, N_HEADS * D_V), jnp.float32),   # packed head contexts
            ],
        ),
        compiler_params=compiler_params,
    )(scales, x, keybias, wfused, wfc, w1, w2)

    if return_attn:
        out, attn = results
        return out, attn
    return results, None


# ----------------------------------------------------------------------------
# Glue: embedding, positional encoding, mask, Encoder_Protein control flow.
# ----------------------------------------------------------------------------
def positional_encoding(L, d_model):
    position = np.arange(L, dtype=np.float32)[:, None]
    div_term = np.exp(np.arange(0, d_model, 2, dtype=np.float32)
                      * (-math.log(10000.0) / d_model))
    pe = np.zeros((L, d_model), dtype=np.float32)
    pe[:, 0::2] = np.sin(position * div_term)
    pe[:, 1::2] = np.cos(position * div_term)
    return jnp.asarray(pe)


def get_key_pad_bias(tokens):
    # (B, 1, L) additive bias: MASK_FILL where the key token == 0 (padding)
    return (tokens == 0).astype(jnp.float32)[:, None, :] * MASK_FILL


def init_layer_params(key, scale=0.05):
    ks = jax.random.split(key, 7)
    shapes = [(D_MODEL, D_MODEL),          # fc0  (stored as (in, out))
              (D_MODEL, D_K * N_HEADS),    # W_Q
              (D_MODEL, D_K * N_HEADS),    # W_K
              (D_MODEL, D_V * N_HEADS),    # W_V
              (N_HEADS * D_V, D_MODEL),    # fc
              (D_MODEL, D_FF),             # ffn fc1
              (D_FF, D_MODEL)]             # ffn fc2
    return tuple(scale * jax.random.normal(k, s, dtype=jnp.float32)
                 for k, s in zip(ks, shapes))


def _stack_params(param_sets):
    """Fuse fc0|W_Q|W_K|W_V per layer (W_Q pre-scaled by 1/sqrt(d_k)) and stack."""
    inv_sqrt_dk = 1.0 / math.sqrt(D_K)
    wfused = jnp.stack([jnp.concatenate([p[0], p[1] * inv_sqrt_dk, p[2], p[3]], axis=1)
                        for p in param_sets])               # (S, 128, 512)
    wfc = jnp.stack([p[4] for p in param_sets])              # (S, 128, 128)
    w1 = jnp.stack([p[5] for p in param_sets])                # (S, 128, 512)
    w2 = jnp.stack([p[6] for p in param_sets])                # (S, 512, 128)
    return wfused, wfc, w1, w2


def encoder_protein_forward(tokens, emb_table, stream0_params, stream1_params,
                            attn_dtype=jnp.float32):
    """Reproduces Encoder_Protein.forward (dropout = identity / inference)."""
    B, L = tokens.shape
    enc_outputs = emb_table[tokens] + positional_encoding(L, D_MODEL)[None]  # (B,L,128)
    keybias = get_key_pad_bias(tokens)                                       # (B,1,L)

    # stream0 layers all see the SAME (never-updated) stream0 = enc_outputs,
    # and stream1's first layer sees stream0 + enc_outputs = 2 * enc_outputs.
    # These n_layers + 1 applications are independent -> one pallas_call, with
    # the activations passed ONCE and the per-stream scale applied in-kernel.
    n0 = len(stream0_params)
    scales = jnp.asarray([1.0] * n0 + [2.0], dtype=jnp.float32)
    stacked = _stack_params(list(stream0_params) + [stream1_params[0]])
    outs, attns = encoder_layers_pallas(enc_outputs, keybias, scales, stacked,
                                        attn_dtype=attn_dtype)

    enc_self_attns0 = [(outs[i], attns[i]) for i in range(n0)]
    stream1 = outs[n0]
    enc_self_attns1 = [attns[n0]]

    # remaining (chained) stream1 layers, if n_layers > 1
    for p in stream1_params[1:]:
        o, a = encoder_layers_pallas(stream1, keybias,
                                     jnp.ones((1,), jnp.float32),
                                     _stack_params([p]), attn_dtype=attn_dtype)
        stream1 = o[0]
        enc_self_attns1.append(a[0])

    return stream1, enc_self_attns0, enc_self_attns1


# ----------------------------------------------------------------------------
# Pure-JAX reference (for correctness check of the Pallas layer)
# ----------------------------------------------------------------------------
def _layer_ref(x, mask_bll, params):
    wfc0, wq, wk, wv, wfc, w1, w2 = params
    B, L, D = x.shape
    residual = x @ wfc0
    q = (x @ wq).reshape(B, L, N_HEADS, D_K).transpose(0, 2, 1, 3)
    k = (x @ wk).reshape(B, L, N_HEADS, D_K).transpose(0, 2, 1, 3)
    v = (x @ wv).reshape(B, L, N_HEADS, D_V).transpose(0, 2, 1, 3)
    scores = jnp.einsum("bhqd,bhkd->bhqk", q, k) / math.sqrt(D_K)
    scores = jnp.where(mask_bll[:, None, :, :] > 0.5, MASK_FILL, scores)
    attn = jax.nn.softmax(scores, axis=-1)
    ctx = jnp.einsum("bhqk,bhkd->bhqd", attn, v).transpose(0, 2, 1, 3).reshape(B, L, -1)
    y = ctx @ wfc + residual
    y = (y - y.mean(-1, keepdims=True)) * lax.rsqrt(y.var(-1, keepdims=True) + LN_EPS)
    ff = jnp.maximum(y @ w1, 0.0) @ w2
    z = ff + y
    z = (z - z.mean(-1, keepdims=True)) * lax.rsqrt(z.var(-1, keepdims=True) + LN_EPS)
    return z, attn


if __name__ == "__main__":
    VOCAB_SIZE = 25
    B, L = 2, 8

    root = jax.random.PRNGKey(0)
    k_emb, k_tok, k_s0, k_s1 = jax.random.split(root, 4)

    emb_table = 0.05 * jax.random.normal(k_emb, (VOCAB_SIZE, D_MODEL), dtype=jnp.float32)
    tokens = jax.random.randint(k_tok, (B, L), 0, VOCAB_SIZE, dtype=jnp.int32)
    tokens = tokens.at[:, 0].set(1)   # at least one non-pad key per sequence
    tokens = tokens.at[:, -1].set(0)  # at least one padded key (exercise the mask)

    stream0_params = [init_layer_params(k) for k in jax.random.split(k_s0, N_LAYERS)]
    stream1_params = [init_layer_params(k) for k in jax.random.split(k_s1, N_LAYERS)]

    stream1, attns0, attns1 = encoder_protein_forward(
        tokens, emb_table, stream0_params, stream1_params)
    jax.block_until_ready(stream1)
    jax.block_until_ready(attns0)
    jax.block_until_ready(attns1)

    # correctness check against pure-JAX reference
    enc_outputs = emb_table[tokens] + positional_encoding(L, D_MODEL)[None]
    key_pad = (tokens == 0).astype(jnp.float32)
    mask_bll = jnp.broadcast_to(key_pad[:, None, :], (B, L, L))
    ref0_out, ref0_attn = _layer_ref(enc_outputs, mask_bll, stream0_params[0])
    ref1_out, ref1_attn = _layer_ref(2.0 * enc_outputs, mask_bll, stream1_params[0])

    TOL = dict(atol=5e-3, rtol=5e-3)  # approx reciprocal in softmax denominator
    np.testing.assert_allclose(np.asarray(attns0[0][0]), np.asarray(ref0_out), **TOL)
    np.testing.assert_allclose(np.asarray(attns0[0][1]), np.asarray(ref0_attn), **TOL)
    np.testing.assert_allclose(np.asarray(stream1), np.asarray(ref1_out), **TOL)
    np.testing.assert_allclose(np.asarray(attns1[0]), np.asarray(ref1_attn), **TOL)

    print("KERNEL_OK")
</pallas_src>

<mosaic_0001>
module attributes {stable_mosaic.version = 11 : i64} {
  func.func @_encoder_layer_kernel(%arg0: i32, %arg1: i32, %arg2: i32, %arg3: memref<2xf32, #tpu.memory_space<smem>>, %arg4: memref<1x8x128xf32, #tpu.memory_space<vmem>>, %arg5: memref<1x1x8xf32, #tpu.memory_space<vmem>>, %arg6: memref<1x128x512xf32, #tpu.memory_space<vmem>>, %arg7: memref<1x128x128xf32, #tpu.memory_space<vmem>>, %arg8: memref<1x128x512xf32, #tpu.memory_space<vmem>>, %arg9: memref<1x512x128xf32, #tpu.memory_space<vmem>>, %arg10: memref<1x1x8x128xf32, #tpu.memory_space<vmem>>, %arg11: memref<1x1x4x8x8xf32, #tpu.memory_space<vmem>>, %arg12: memref<8x512xf32, #tpu.memory_space<vmem>>, %arg13: memref<8x128xf32, #tpu.memory_space<vmem>>) attributes {dimension_semantics = [#tpu.dimension_semantics<parallel>, #tpu.dimension_semantics<parallel>, #tpu.dimension_semantics<arbitrary>], iteration_bounds = array<i64: 2, 2, 1>, scalar_prefetch = 1 : i64, scratch_operands = 2 : i64, tpu.core_type = #tpu.core_type<tc>, window_params = [{transform_indices = @transform_0, window_bounds = array<i64: 1, 8, 128>}, {transform_indices = @transform_1, window_bounds = array<i64: 1, 1, 8>}, {transform_indices = @transform_2, window_bounds = array<i64: 1, 128, 512>}, {transform_indices = @transform_3, window_bounds = array<i64: 1, 128, 128>}, {transform_indices = @transform_4, window_bounds = array<i64: 1, 128, 512>}, {transform_indices = @transform_5, window_bounds = array<i64: 1, 512, 128>}, {transform_indices = @transform_6, window_bounds = array<i64: 1, 1, 8, 128>}, {transform_indices = @transform_7, window_bounds = array<i64: 1, 1, 4, 8, 8>}]} {
    %c0_i32 = arith.constant 0 : i32
    %0 = arith.cmpi eq, %arg2, %c0_i32 : i32
    %1 = arith.extui %0 : i1 to i32
    %c0_i32_0 = arith.constant 0 : i32
    %2 = arith.cmpi ne, %1, %c0_i32_0 : i32
    scf.if %2 {
      %c0_72 = arith.constant 0 : index
      %c0_73 = arith.constant 0 : index
      %c0_74 = arith.constant 0 : index
      %150 = vector.load %arg4[%c0_72, %c0_73, %c0_74] : memref<1x8x128xf32, #tpu.memory_space<vmem>>, vector<1x8x128xf32>
      %151 = vector.shape_cast %150 : vector<1x8x128xf32> to vector<8x128xf32>
      %152 = arith.index_cast %arg0 : i32 to index
      %153 = memref.load %arg3[%152] : memref<2xf32, #tpu.memory_space<smem>>
      %154 = vector.broadcast %153 : f32 to vector<8x128xf32>
      %155 = arith.mulf %151, %154 : vector<8x128xf32>
      %c0_75 = arith.constant 0 : index
      %c0_76 = arith.constant 0 : index
      %c0_77 = arith.constant 0 : index
      %156 = vector.load %arg6[%c0_75, %c0_76, %c0_77] : memref<1x128x512xf32, #tpu.memory_space<vmem>>, vector<1x128x512xf32>
      %157 = vector.shape_cast %156 : vector<1x128x512xf32> to vector<128x512xf32>
      %cst_78 = arith.constant dense<0.000000e+00> : vector<8x512xf32>
      %158 = tpu.matmul %155, %157, %cst_78 {dimension_numbers = #tpu.dot_dimension_numbers<[1], [0], [0], [1], [0, 0, 1, 1], [], []>} : vector<8x128xf32>, vector<128x512xf32>, vector<8x512xf32> -> vector<8x512xf32>
      %c0_79 = arith.constant 0 : index
      %c0_80 = arith.constant 0 : index
      %159 = vector.load %arg12[%c0_79, %c0_80] : memref<8x512xf32, #tpu.memory_space<vmem>>, vector<8x512xf32>
      tpu.vector_store %arg12[%c0_79, %c0_80], %158 {strides = array<i32>} : memref<8x512xf32, #tpu.memory_space<vmem>>, vector<8x512xf32>,
    } else {
    }
    %c8_i32 = arith.constant 8 : i32
    %3 = arith.muli %arg2, %c8_i32 : i32
    %4 = tpu.assume_multiple %3, 8 : i32
    %5 = arith.index_cast %4 : i32 to index
    %c0 = arith.constant 0 : index
    %6 = vector.load %arg12[%5, %c0] : memref<8x512xf32, #tpu.memory_space<vmem>>, vector<8x128xf32>
    %7 = arith.index_cast %4 : i32 to index
    %c128 = arith.constant 128 : index
    %8 = vector.load %arg12[%7, %c128] : memref<8x512xf32, #tpu.memory_space<vmem>>, vector<8x128xf32>
    %c0_1 = arith.constant 0 : index
    %c256 = arith.constant 256 : index
    %9 = vector.load %arg12[%c0_1, %c256] : memref<8x512xf32, #tpu.memory_space<vmem>>, vector<8x128xf32>
    %c0_2 = arith.constant 0 : index
    %c384 = arith.constant 384 : index
    %10 = vector.load %arg12[%c0_2, %c384] : memref<8x512xf32, #tpu.memory_space<vmem>>, vector<8x128xf32>
    %c0_3 = arith.constant 0 : index
    %c0_4 = arith.constant 0 : index
    %c0_5 = arith.constant 0 : index
    %11 = vector.load %arg5[%c0_3, %c0_4, %c0_5] : memref<1x1x8xf32, #tpu.memory_space<vmem>>, vector<1x1x8xf32>
    %12 = vector.shape_cast %11 : vector<1x1x8xf32> to vector<1x8xf32>
    %13 = vector.extract_strided_slice %8 {offsets = [0, 0], sizes = [8, 32], strides = [1, 1]} : vector<8x128xf32> to vector<8x32xf32>
    %14 = vector.extract_strided_slice %9 {offsets = [0, 0], sizes = [8, 32], strides = [1, 1]} : vector<8x128xf32> to vector<8x32xf32>
    %15 = vector.extract_strided_slice %10 {offsets = [0, 0], sizes = [8, 32], strides = [1, 1]} : vector<8x128xf32> to vector<8x32xf32>
    %cst = arith.constant dense<0.000000e+00> : vector<8x8xf32>
    %16 = tpu.matmul %13, %14, %cst {dimension_numbers = #tpu.dot_dimension_numbers<[1], [1], [0], [0], [0, 0, 1, 0], [], []>} : vector<8x32xf32>, vector<8x32xf32>, vector<8x8xf32> -> vector<8x8xf32>
    %17 = vector.broadcast %12 : vector<1x8xf32> to vector<8x8xf32>
    %18 = arith.addf %16, %17 : vector<8x8xf32>
    %cst_6 = arith.constant dense<0xFF800000> : vector<8xf32>
    %19 = vector.multi_reduction <maximumf>, %18, %cst_6 [1] : vector<8x8xf32> to vector<8xf32>
    %20 = vector.shape_cast %19 : vector<8xf32> to vector<8x1xf32>
    %21 = vector.broadcast %20 : vector<8x1xf32> to vector<8x8xf32>
    %22 = arith.subf %18, %21 : vector<8x8xf32>
    %23 = math.exp %22 : vector<8x8xf32>
    %cst_7 = arith.constant dense<0.000000e+00> : vector<8xf32>
    %24 = vector.multi_reduction <add>, %23, %cst_7 [1] : vector<8x8xf32> to vector<8xf32>
    %25 = vector.shape_cast %24 : vector<8xf32> to vector<8x1xf32>
    %26 = tpu.reciprocal %25 {approx = true} : vector<8x1xf32> -> vector<8x1xf32>
    %27 = vector.broadcast %26 : vector<8x1xf32> to vector<8x8xf32>
    %28 = arith.mulf %23, %27 : vector<8x8xf32>
    %c0_8 = arith.constant 0 : index
    %c0_9 = arith.constant 0 : index
    %c0_10 = arith.constant 0 : index
    %c0_11 = arith.constant 0 : index
    %c0_12 = arith.constant 0 : index
    %29 = vector.load %arg11[%c0_8, %c0_9, %c0_10, %c0_11, %c0_12] : memref<1x1x4x8x8xf32, #tpu.memory_space<vmem>>, vector<1x1x1x8x8xf32>
    %30 = vector.shape_cast %29 : vector<1x1x1x8x8xf32> to vector<8x8xf32>
    %31 = vector.shape_cast %28 : vector<8x8xf32> to vector<1x1x1x8x8xf32>
    tpu.vector_store %arg11[%c0_8, %c0_9, %c0_10, %c0_11, %c0_12], %31 {strides = array<i32>} : memref<1x1x4x8x8xf32, #tpu.memory_space<vmem>>, vector<1x1x1x8x8xf32>,
    %cst_13 = arith.constant dense<0.000000e+00> : vector<8x32xf32>
    %32 = tpu.matmul %28, %15, %cst_13 {dimension_numbers = #tpu.dot_dimension_numbers<[1], [0], [0], [1], [0, 0, 1, 1], [], []>} : vector<8x8xf32>, vector<8x32xf32>, vector<8x32xf32> -> vector<8x32xf32>
    %c0_14 = arith.constant 0 : index
    %c0_15 = arith.constant 0 : index
    %33 = vector.load %arg13[%c0_14, %c0_15] : memref<8x128xf32, #tpu.memory_space<vmem>>, vector<8x32xf32>
    tpu.vector_store %arg13[%c0_14, %c0_15], %32 {strides = array<i32>} : memref<8x128xf32, #tpu.memory_space<vmem>>, vector<8x32xf32>,
    %34 = vector.extract_strided_slice %8 {offsets = [0, 32], sizes = [8, 32], strides = [1, 1]} : vector<8x128xf32> to vector<8x32xf32>
    %35 = vector.extract_strided_slice %9 {offsets = [0, 32], sizes = [8, 32], strides = [1, 1]} : vector<8x128xf32> to vector<8x32xf32>
    %36 = vector.extract_strided_slice %10 {offsets = [0, 32], sizes = [8, 32], strides = [1, 1]} : vector<8x128xf32> to vector<8x32xf32>
    %cst_16 = arith.constant dense<0.000000e+00> : vector<8x8xf32>
    %37 = tpu.matmul %34, %35, %cst_16 {dimension_numbers = #tpu.dot_dimension_numbers<[1], [1], [0], [0], [0, 0, 1, 0], [], []>} : vector<8x32xf32>, vector<8x32xf32>, vector<8x8xf32> -> vector<8x8xf32>
    %38 = vector.broadcast %12 : vector<1x8xf32> to vector<8x8xf32>
    %39 = arith.addf %37, %38 : vector<8x8xf32>
    %cst_17 = arith.constant dense<0xFF800000> : vector<8xf32>
    %40 = vector.multi_reduction <maximumf>, %39, %cst_17 [1] : vector<8x8xf32> to vector<8xf32>
    %41 = vector.shape_cast %40 : vector<8xf32> to vector<8x1xf32>
    %42 = vector.broadcast %41 : vector<8x1xf32> to vector<8x8xf32>
    %43 = arith.subf %39, %42 : vector<8x8xf32>
    %44 = math.exp %43 : vector<8x8xf32>
    %cst_18 = arith.constant dense<0.000000e+00> : vector<8xf32>
    %45 = vector.multi_reduction <add>, %44, %cst_18 [1] : vector<8x8xf32> to vector<8xf32>
    %46 = vector.shape_cast %45 : vector<8xf32> to vector<8x1xf32>
    %47 = tpu.reciprocal %46 {approx = true} : vector<8x1xf32> -> vector<8x1xf32>
    %48 = vector.broadcast %47 : vector<8x1xf32> to vector<8x8xf32>
    %49 = arith.mulf %44, %48 : vector<8x8xf32>
    %c0_19 = arith.constant 0 : index
    %c0_20 = arith.constant 0 : index
    %c1 = arith.constant 1 : index
    %c0_21 = arith.constant 0 : index
    %c0_22 = arith.constant 0 : index
    %50 = vector.load %arg11[%c0_19, %c0_20, %c1, %c0_21, %c0_22] : memref<1x1x4x8x8xf32, #tpu.memory_space<vmem>>, vector<1x1x1x8x8xf32>
    %51 = vector.shape_cast %50 : vector<1x1x1x8x8xf32> to vector<8x8xf32>
    %52 = vector.shape_cast %49 : vector<8x8xf32> to vector<1x1x1x8x8xf32>
    tpu.vector_store %arg11[%c0_19, %c0_20, %c1, %c0_21, %c0_22], %52 {strides = array<i32>} : memref<1x1x4x8x8xf32, #tpu.memory_space<vmem>>, vector<1x1x1x8x8xf32>,
    %cst_23 = arith.constant dense<0.000000e+00> : vector<8x32xf32>
    %53 = tpu.matmul %49, %36, %cst_23 {dimension_numbers = #tpu.dot_dimension_numbers<[1], [0], [0], [1], [0, 0, 1, 1], [], []>} : vector<8x8xf32>, vector<8x32xf32>, vector<8x32xf32> -> vector<8x32xf32>
    %c0_24 = arith.constant 0 : index
    %c32 = arith.constant 32 : index
    %54 = vector.load %arg13[%c0_24, %c32] : memref<8x128xf32, #tpu.memory_space<vmem>>, vector<8x32xf32>
    tpu.vector_store %arg13[%c0_24, %c32], %53 {strides = array<i32>} : memref<8x128xf32, #tpu.memory_space<vmem>>, vector<8x32xf32>,
    %55 = vector.extract_strided_slice %8 {offsets = [0, 64], sizes = [8, 32], strides = [1, 1]} : vector<8x128xf32> to vector<8x32xf32>
    %56 = vector.extract_strided_slice %9 {offsets = [0, 64], sizes = [8, 32], strides = [1, 1]} : vector<8x128xf32> to vector<8x32xf32>
    %57 = vector.extract_strided_slice %10 {offsets = [0, 64], sizes = [8, 32], strides = [1, 1]} : vector<8x128xf32> to vector<8x32xf32>
    %cst_25 = arith.constant dense<0.000000e+00> : vector<8x8xf32>
    %58 = tpu.matmul %55, %56, %cst_25 {dimension_numbers = #tpu.dot_dimension_numbers<[1], [1], [0], [0], [0, 0, 1, 0], [], []>} : vector<8x32xf32>, vector<8x32xf32>, vector<8x8xf32> -> vector<8x8xf32>
    %59 = vector.broadcast %12 : vector<1x8xf32> to vector<8x8xf32>
    %60 = arith.addf %58, %59 : vector<8x8xf32>
    %cst_26 = arith.constant dense<0xFF800000> : vector<8xf32>
    %61 = vector.multi_reduction <maximumf>, %60, %cst_26 [1] : vector<8x8xf32> to vector<8xf32>
    %62 = vector.shape_cast %61 : vector<8xf32> to vector<8x1xf32>
    %63 = vector.broadcast %62 : vector<8x1xf32> to vector<8x8xf32>
    %64 = arith.subf %60, %63 : vector<8x8xf32>
    %65 = math.exp %64 : vector<8x8xf32>
    %cst_27 = arith.constant dense<0.000000e+00> : vector<8xf32>
    %66 = vector.multi_reduction <add>, %65, %cst_27 [1] : vector<8x8xf32> to vector<8xf32>
    %67 = vector.shape_cast %66 : vector<8xf32> to vector<8x1xf32>
    %68 = tpu.reciprocal %67 {approx = true} : vector<8x1xf32> -> vector<8x1xf32>
    %69 = vector.broadcast %68 : vector<8x1xf32> to vector<8x8xf32>
    %70 = arith.mulf %65, %69 : vector<8x8xf32>
    %c0_28 = arith.constant 0 : index
    %c0_29 = arith.constant 0 : index
    %c2 = arith.constant 2 : index
    %c0_30 = arith.constant 0 : index
    %c0_31 = arith.constant 0 : index
    %71 = vector.load %arg11[%c0_28, %c0_29, %c2, %c0_30, %c0_31] : memref<1x1x4x8x8xf32, #tpu.memory_space<vmem>>, vector<1x1x1x8x8xf32>
    %72 = vector.shape_cast %71 : vector<1x1x1x8x8xf32> to vector<8x8xf32>
    %73 = vector.shape_cast %70 : vector<8x8xf32> to vector<1x1x1x8x8xf32>
    tpu.vector_store %arg11[%c0_28, %c0_29, %c2, %c0_30, %c0_31], %73 {strides = array<i32>} : memref<1x1x4x8x8xf32, #tpu.memory_space<vmem>>, vector<1x1x1x8x8xf32>,
    %cst_32 = arith.constant dense<0.000000e+00> : vector<8x32xf32>
    %74 = tpu.matmul %70, %57, %cst_32 {dimension_numbers = #tpu.dot_dimension_numbers<[1], [0], [0], [1], [0, 0, 1, 1], [], []>} : vector<8x8xf32>, vector<8x32xf32>, vector<8x32xf32> -> vector<8x32xf32>
    %c0_33 = arith.constant 0 : index
    %c64 = arith.constant 64 : index
    %75 = vector.load %arg13[%c0_33, %c64] : memref<8x128xf32, #tpu.memory_space<vmem>>, vector<8x32xf32>
    tpu.vector_store %arg13[%c0_33, %c64], %74 {strides = array<i32>} : memref<8x128xf32, #tpu.memory_space<vmem>>, vector<8x32xf32>,
    %76 = vector.extract_strided_slice %8 {offsets = [0, 96], sizes = [8, 32], strides = [1, 1]} : vector<8x128xf32> to vector<8x32xf32>
    %77 = vector.extract_strided_slice %9 {offsets = [0, 96], sizes = [8, 32], strides = [1, 1]} : vector<8x128xf32> to vector<8x32xf32>
    %78 = vector.extract_strided_slice %10 {offsets = [0, 96], sizes = [8, 32], strides = [1, 1]} : vector<8x128xf32> to vector<8x32xf32>
    %cst_34 = arith.constant dense<0.000000e+00> : vector<8x8xf32>
    %79 = tpu.matmul %76, %77, %cst_34 {dimension_numbers = #tpu.dot_dimension_numbers<[1], [1], [0], [0], [0, 0, 1, 0], [], []>} : vector<8x32xf32>, vector<8x32xf32>, vector<8x8xf32> -> vector<8x8xf32>
    %80 = vector.broadcast %12 : vector<1x8xf32> to vector<8x8xf32>
    %81 = arith.addf %79, %80 : vector<8x8xf32>
    %cst_35 = arith.constant dense<0xFF800000> : vector<8xf32>
    %82 = vector.multi_reduction <maximumf>, %81, %cst_35 [1] : vector<8x8xf32> to vector<8xf32>
    %83 = vector.shape_cast %82 : vector<8xf32> to vector<8x1xf32>
    %84 = vector.broadcast %83 : vector<8x1xf32> to vector<8x8xf32>
    %85 = arith.subf %81, %84 : vector<8x8xf32>
    %86 = math.exp %85 : vector<8x8xf32>
    %cst_36 = arith.constant dense<0.000000e+00> : vector<8xf32>
    %87 = vector.multi_reduction <add>, %86, %cst_36 [1] : vector<8x8xf32> to vector<8xf32>
    %88 = vector.shape_cast %87 : vector<8xf32> to vector<8x1xf32>
    %89 = tpu.reciprocal %88 {approx = true} : vector<8x1xf32> -> vector<8x1xf32>
    %90 = vector.broadcast %89 : vector<8x1xf32> to vector<8x8xf32>
    %91 = arith.mulf %86, %90 : vector<8x8xf32>
    %c0_37 = arith.constant 0 : index
    %c0_38 = arith.constant 0 : index
    %c3 = arith.constant 3 : index
    %c0_39 = arith.constant 0 : index
    %c0_40 = arith.constant 0 : index
    %92 = vector.load %arg11[%c0_37, %c0_38, %c3, %c0_39, %c0_40] : memref<1x1x4x8x8xf32, #tpu.memory_space<vmem>>, vector<1x1x1x8x8xf32>
    %93 = vector.shape_cast %92 : vector<1x1x1x8x8xf32> to vector<8x8xf32>
    %94 = vector.shape_cast %91 : vector<8x8xf32> to vector<1x1x1x8x8xf32>
    tpu.vector_store %arg11[%c0_37, %c0_38, %c3, %c0_39, %c0_40], %94 {strides = array<i32>} : memref<1x1x4x8x8xf32, #tpu.memory_space<vmem>>, vector<1x1x1x8x8xf32>,
    %cst_41 = arith.constant dense<0.000000e+00> : vector<8x32xf32>
    %95 = tpu.matmul %91, %78, %cst_41 {dimension_numbers = #tpu.dot_dimension_numbers<[1], [0], [0], [1], [0, 0, 1, 1], [], []>} : vector<8x8xf32>, vector<8x32xf32>, vector<8x32xf32> -> vector<8x32xf32>
    %c0_42 = arith.constant 0 : index
    %c96 = arith.constant 96 : index
    %96 = vector.load %arg13[%c0_42, %c96] : memref<8x128xf32, #tpu.memory_space<vmem>>, vector<8x32xf32>
    tpu.vector_store %arg13[%c0_42, %c96], %95 {strides = array<i32>} : memref<8x128xf32, #tpu.memory_space<vmem>>, vector<8x32xf32>,
    %c0_43 = arith.constant 0 : index
    %c0_44 = arith.constant 0 : index
    %97 = vector.load %arg13[%c0_43, %c0_44] : memref<8x128xf32, #tpu.memory_space<vmem>>, vector<8x128xf32>
    %c0_45 = arith.constant 0 : index
    %c0_46 = arith.constant 0 : index
    %c0_47 = arith.constant 0 : index
    %98 = vector.load %arg7[%c0_45, %c0_46, %c0_47] : memref<1x128x128xf32, #tpu.memory_space<vmem>>, vector<1x128x128xf32>
    %99 = vector.shape_cast %98 : vector<1x128x128xf32> to vector<128x128xf32>
    %cst_48 = arith.constant dense<0.000000e+00> : vector<8x128xf32>
    %100 = tpu.matmul %97, %99, %cst_48 {dimension_numbers = #tpu.dot_dimension_numbers<[1], [0], [0], [1], [0, 0, 1, 1], [], []>} : vector<8x128xf32>, vector<128x128xf32>, vector<8x128xf32> -> vector<8x128xf32>
    %101 = arith.addf %6, %100 : vector<8x128xf32>
    %cst_49 = arith.constant dense<0.000000e+00> : vector<8xf32>
    %102 = vector.multi_reduction <add>, %101, %cst_49 [1] : vector<8x128xf32> to vector<8xf32>
    %103 = vector.shape_cast %102 : vector<8xf32> to vector<8x1xf32>
    %cst_50 = arith.constant 1.280000e+02 : f32
    %104 = vector.broadcast %cst_50 : f32 to vector<8x1xf32>
    %105 = arith.divf %103, %104 : vector<8x1xf32>
    %106 = vector.broadcast %105 : vector<8x1xf32> to vector<8x128xf32>
    %107 = arith.subf %101, %106 : vector<8x128xf32>
    %108 = arith.mulf %107, %107 : vector<8x128xf32>
    %cst_51 = arith.constant dense<0.000000e+00> : vector<8xf32>
    %109 = vector.multi_reduction <add>, %108, %cst_51 [1] : vector<8x128xf32> to vector<8xf32>
    %110 = vector.shape_cast %109 : vector<8xf32> to vector<8x1xf32>
    %cst_52 = arith.constant 1.280000e+02 : f32
    %111 = vector.broadcast %cst_52 : f32 to vector<8x1xf32>
    %112 = arith.divf %110, %111 : vector<8x1xf32>
    %113 = vector.broadcast %105 : vector<8x1xf32> to vector<8x128xf32>
    %114 = arith.subf %101, %113 : vector<8x128xf32>
    %cst_53 = arith.constant 9.99999974E-6 : f32
    %115 = vector.broadcast %cst_53 : f32 to vector<8x1xf32>
    %116 = arith.addf %112, %115 : vector<8x1xf32>
    %117 = math.rsqrt %116 : vector<8x1xf32>
    %118 = vector.broadcast %117 : vector<8x1xf32> to vector<8x128xf32>
    %119 = arith.mulf %114, %118 : vector<8x128xf32>
    %c0_54 = arith.constant 0 : index
    %c0_55 = arith.constant 0 : index
    %c0_56 = arith.constant 0 : index
    %120 = vector.load %arg8[%c0_54, %c0_55, %c0_56] : memref<1x128x512xf32, #tpu.memory_space<vmem>>, vector<1x128x512xf32>
    %121 = vector.shape_cast %120 : vector<1x128x512xf32> to vector<128x512xf32>
    %cst_57 = arith.constant dense<0.000000e+00> : vector<8x512xf32>
    %122 = tpu.matmul %119, %121, %cst_57 {dimension_numbers = #tpu.dot_dimension_numbers<[1], [0], [0], [1], [0, 0, 1, 1], [], []>} : vector<8x128xf32>, vector<128x512xf32>, vector<8x512xf32> -> vector<8x512xf32>
    %cst_58 = arith.constant 0.000000e+00 : f32
    %123 = vector.broadcast %cst_58 : f32 to vector<8x512xf32>
    %124 = arith.maximumf %122, %123 : vector<8x512xf32>
    %c0_59 = arith.constant 0 : index
    %c0_60 = arith.constant 0 : index
    %c0_61 = arith.constant 0 : index
    %125 = vector.load %arg9[%c0_59, %c0_60, %c0_61] : memref<1x512x128xf32, #tpu.memory_space<vmem>>, vector<1x512x128xf32>
    %126 = vector.shape_cast %125 : vector<1x512x128xf32> to vector<512x128xf32>
    %cst_62 = arith.constant dense<0.000000e+00> : vector<8x128xf32>
    %127 = tpu.matmul %124, %126, %cst_62 {dimension_numbers = #tpu.dot_dimension_numbers<[1], [0], [0], [1], [0, 0, 1, 1], [], []>} : vector<8x512xf32>, vector<512x128xf32>, vector<8x128xf32> -> vector<8x128xf32>
    %128 = arith.addf %127, %119 : vector<8x128xf32>
    %cst_63 = arith.constant dense<0.000000e+00> : vector<8xf32>
    %129 = vector.multi_reduction <add>, %128, %cst_63 [1] : vector<8x128xf32> to vector<8xf32>
    %130 = vector.shape_cast %129 : vector<8xf32> to vector<8x1xf32>
    %cst_64 = arith.constant 1.280000e+02 : f32
    %131 = vector.broadcast %cst_64 : f32 to vector<8x1xf32>
    %132 = arith.divf %130, %131 : vector<8x1xf32>
    %133 = vector.broadcast %132 : vector<8x1xf32> to vector<8x128xf32>
    %134 = arith.subf %128, %133 : vector<8x128xf32>
    %135 = arith.mulf %134, %134 : vector<8x128xf32>
    %cst_65 = arith.constant dense<0.000000e+00> : vector<8xf32>
    %136 = vector.multi_reduction <add>, %135, %cst_65 [1] : vector<8x128xf32> to vector<8xf32>
    %137 = vector.shape_cast %136 : vector<8xf32> to vector<8x1xf32>
    %cst_66 = arith.constant 1.280000e+02 : f32
    %138 = vector.broadcast %cst_66 : f32 to vector<8x1xf32>
    %139 = arith.divf %137, %138 : vector<8x1xf32>
    %140 = vector.broadcast %132 : vector<8x1xf32> to vector<8x128xf32>
    %141 = arith.subf %128, %140 : vector<8x128xf32>
    %cst_67 = arith.constant 9.99999974E-6 : f32
    %142 = vector.broadcast %cst_67 : f32 to vector<8x1xf32>
    %143 = arith.addf %139, %142 : vector<8x1xf32>
    %144 = math.rsqrt %143 : vector<8x1xf32>
    %145 = vector.broadcast %144 : vector<8x1xf32> to vector<8x128xf32>
    %146 = arith.mulf %141, %145 : vector<8x128xf32>
    %c0_68 = arith.constant 0 : index
    %c0_69 = arith.constant 0 : index
    %c0_70 = arith.constant 0 : index
    %c0_71 = arith.constant 0 : index
    %147 = vector.load %arg10[%c0_68, %c0_69, %c0_70, %c0_71] : memref<1x1x8x128xf32, #tpu.memory_space<vmem>>, vector<1x1x8x128xf32>
    %148 = vector.shape_cast %147 : vector<1x1x8x128xf32> to vector<8x128xf32>
    %149 = vector.shape_cast %146 : vector<8x128xf32> to vector<1x1x8x128xf32>
    tpu.vector_store %arg10[%c0_68, %c0_69, %c0_70, %c0_71], %149 {strides = array<i32>} : memref<1x1x8x128xf32, #tpu.memory_space<vmem>>, vector<1x1x8x128xf32>,
    return
  }
  func.func @transform_0(%arg0: i32, %arg1: i32, %arg2: i32, %arg3: memref<2xf32, #tpu.memory_space<smem>>) -> (i32, i32, i32) {
    %c0_i32 = arith.constant 0 : i32
    %c0_i32_0 = arith.constant 0 : i32
    %c0_i32_1 = arith.constant 0 : i32
    return %arg1, %c0_i32, %c0_i32_0 : i32, i32, i32
  }
  func.func @transform_1(%arg0: i32, %arg1: i32, %arg2: i32, %arg3: memref<2xf32, #tpu.memory_space<smem>>) -> (i32, i32, i32) {
    %c0_i32 = arith.constant 0 : i32
    %c0_i32_0 = arith.constant 0 : i32
    %c0_i32_1 = arith.constant 0 : i32
    return %arg1, %c0_i32, %c0_i32_0 : i32, i32, i32
  }
  func.func @transform_2(%arg0: i32, %arg1: i32, %arg2: i32, %arg3: memref<2xf32, #tpu.memory_space<smem>>) -> (i32, i32, i32) {
    %c0_i32 = arith.constant 0 : i32
    %c0_i32_0 = arith.constant 0 : i32
    %c0_i32_1 = arith.constant 0 : i32
    return %arg0, %c0_i32, %c0_i32_0 : i32, i32, i32
  }
  func.func @transform_3(%arg0: i32, %arg1: i32, %arg2: i32, %arg3: memref<2xf32, #tpu.memory_space<smem>>) -> (i32, i32, i32) {
    %c0_i32 = arith.constant 0 : i32
    %c0_i32_0 = arith.constant 0 : i32
    %c0_i32_1 = arith.constant 0 : i32
    return %arg0, %c0_i32, %c0_i32_0 : i32, i32, i32
  }
  func.func @transform_4(%arg0: i32, %arg1: i32, %arg2: i32, %arg3: memref<2xf32, #tpu.memory_space<smem>>) -> (i32, i32, i32) {
    %c0_i32 = arith.constant 0 : i32
    %c0_i32_0 = arith.constant 0 : i32
    %c0_i32_1 = arith.constant 0 : i32
    return %arg0, %c0_i32, %c0_i32_0 : i32, i32, i32
  }
  func.func @transform_5(%arg0: i32, %arg1: i32, %arg2: i32, %arg3: memref<2xf32, #tpu.memory_space<smem>>) -> (i32, i32, i32) {
    %c0_i32 = arith.constant 0 : i32
    %c0_i32_0 = arith.constant 0 : i32
    %c0_i32_1 = arith.constant 0 : i32
    return %arg0, %c0_i32, %c0_i32_0 : i32, i32, i32
  }
  func.func @transform_6(%arg0: i32, %arg1: i32, %arg2: i32, %arg3: memref<2xf32, #tpu.memory_space<smem>>) -> (i32, i32, i32, i32) {
    %c0_i32 = arith.constant 0 : i32
    %c0_i32_0 = arith.constant 0 : i32
    return %arg0, %arg1, %arg2, %c0_i32 : i32, i32, i32, i32
  }
  func.func @transform_7(%arg0: i32, %arg1: i32, %arg2: i32, %arg3: memref<2xf32, #tpu.memory_space<smem>>) -> (i32, i32, i32, i32, i32) {
    %c0_i32 = arith.constant 0 : i32
    %c0_i32_0 = arith.constant 0 : i32
    %c0_i32_1 = arith.constant 0 : i32
    return %arg0, %arg1, %c0_i32, %arg2, %c0_i32_0 : i32, i32, i32, i32, i32
  }
}

</mosaic_0001>

<bundles_post_ra>
// kernel: tpu_custom_call.1
= control target key start
LH: loop header
LB: loop body
LE: loop exit
PB: predicated region body
PF: predicated region fallthrough
CT: control target
= control target key end

     0   :  { %s4115_s0 = inlined_call_operand.hbm [shape: f32[2], index: 0, kind: input, shape index: {}]   ;;  %s4116_s1 = inlined_call_operand.hbm [shape: f32[2,8,128], index: 1, kind: input, shape index: {}]   ;;  %s4117_s2 = inlined_call_operand.vmem [shape: f32[2,1,8], index: 2, kind: input, shape index: {}]   ;;  %s4118_s3 = inlined_call_operand.hbm [shape: f32[2,128,512], index: 3, kind: input, shape index: {}]   ;;  %s4119_s4 = inlined_call_operand.hbm [shape: f32[2,128,128], index: 4, kind: input, shape index: {}]   ;;  %s4120_s5 = inlined_call_operand.hbm [shape: f32[2,128,512], index: 5, kind: input, shape index: {}]   ;;  %s4121_s6 = inlined_call_operand.hbm [shape: f32[2,512,128], index: 6, kind: input, shape index: {}]   ;;  %s4122_s7 = inlined_call_operand.hbm [shape: f32[2,2,8,128], index: 7, kind: output, shape index: {0}]   ;;  %s4123_s8 = inlined_call_operand.hbm [shape: f32[2,2,4,8,8], index: 8, kind: output, shape index: {1}]  }
   0x1   :  { %4151 = sst [smem:[#allocation40_spill]] %s4117_s2  ;;  %s2844_s29 = scalar_lea.hbm %s4115_s0, 16 }
   0x2   :  { %4152 = sst [smem:[#allocation41_spill]] %s4118_s3  ;;  %p2845_p0 = scmp.ne.s32.totalorder %s4115_s0, %s2844_s29 }
   0x3   :  { %4153 = sst [smem:[#allocation42_spill]] %s4120_s5  ;;  %p2848_p1 = scmp.lt.u32.totalorder %s2844_s29, %s4115_s0 }
   0x4   :  { %4154 = sst [smem:[#allocation43_spill]] %s4121_s6 }
   0x5   :  { %4155 = sst [smem:[#allocation44_spill]] %s4122_s7  ;;  %p2850_p2 = pnand %p2848_p1, %p2845_p0 }
   0x6   :  { %4156 = sst [smem:[#allocation45_spill]] %s4123_s8 }
   0x7   :  { %2853 = shalt.err (!%p2850_p2)  }
   0x8   :  { %s3194_s12 = smov [#allocation5]  }
   0x9   :  { %15 = dma.hbm_to_smem %s4115_s0, 16, %s3194_s12, [#allocation4] }
   0xa   :  { %3116 = dma.done.wait [#allocation4], 16 }
   0xb   :  { %3117 = vsyncadd [#allocation4], 4294967280 }
   0xc   :  { %17 = sfence }
   0xd   :  { %18 = vsyncpa [#allocation7], 0 }
   0xe   :  { %20 = vsyncpa [#allocation7 + $0x1], 0 }
   0xf   :  { %21 = vsyncpa [#allocation10], 0 }
  0x10   :  { %23 = vsyncpa [#allocation10 + $0x1], 0 }
  0x11   :  { %24 = vsyncpa [#allocation13], 0 }
  0x12   :  { %26 = vsyncpa [#allocation13 + $0x1], 0 }
  0x13   :  { %27 = vsyncpa [#allocation8], 0 }
  0x14   :  { %29 = vsyncpa [#allocation8 + $0x1], 0 }
  0x15   :  { %30 = vsyncpa [#allocation17], 0 }
  0x16   :  { %32 = vsyncpa [#allocation17 + $0x1], 0  ;;  %s3271_s15 = smov 0   ;;  %s3273_s16 = smov 0  }
  0x17   :  { %s3275_s17 = smov 0   ;;  %s3277_s0 = smov 0  }
  0x18   :  { %s3279_s18 = smov 0   ;;  %s3281_s19 = smov 0  }
  0x19   :  { %s3283_s20 = smov 0   ;;  %s3285_s21 = smov 0  }
  0x1a   :  { %s3287_s22 = smov 0   ;;  %s3289_s23 = smov 0  }
  0x1b   :  { %s3291_s24 = smov 0   ;;  %s3293_s25 = smov 0  }
  0x1c   :  { %s3295_s26 = smov 0   ;;  %s3297_s27 = smov 0  }
  0x1d LB: > { %4157 = sst [smem:[#allocation24_spill]] %s3148_s17  ;;  %p4130_p3 = scmp.eq.s32.totalorder %s3192_s27, 0  ;;  %s3192_s27 = sphi %s3297_s27, %s38_s27   ;;  %s3188_s26 = sphi %s3295_s26, %s4222_s26   ;;  %s3184_s25 = sphi %s3293_s25, %s4221_s25   ;;  %s3180_s24 = sphi %s3291_s24, %s4226_s24   ;;  %s3176_s23 = sphi %s3289_s23, %s4219_s23   ;;  %s3172_s22 = sphi %s3287_s22, %s4218_s22   ;;  %s3168_s21 = sphi %s3285_s21, %s4217_s21   ;;  %s3164_s20 = sphi %s3283_s20, %s4216_s20   ;;  %s3160_s19 = sphi %s3281_s19, %s4215_s19   ;;  %s3156_s18 = sphi %s3279_s18, %s4214_s18   ;;  %s3152_s0 = sphi %s3277_s0, %s4213_s0   ;;  %s3148_s17 = sphi %s3275_s17, %s4212_s17   ;;  %s3144_s16 = sphi %s3273_s16, %s4225_s16   ;;  %s3140_s15 = sphi %s3271_s15, %s4224_s15  }
  0x1e   : > { %4158 = sst [smem:[#allocation25_spill]] %s3156_s18  ;;  %p123_p4 = scmp.ne.s32.totalorder %s3160_s19, %s3156_s18 }
  0x1f   : > { %4159 = sst [smem:[#allocation26_spill]] %s3160_s19  ;;  %p4129_p5 = scmp.lt.s32.totalorder %s3192_s27, 4 }
  0x20   : > { %4160 = sst [smem:[#allocation27_spill]] %s3168_s21  ;;  %p125_p6 = por %p123_p4, %p4130_p3 }
  0x21   : > { %4161 = sst [smem:[#allocation28_spill]] %s3172_s22  ;;  %s4124_s29 = sand.u32 1, %s3160_s19  }
  0x22   : > { %4162 = sst [smem:[#allocation29_spill]] %s3176_s23  ;;  %s3351_s30 = sshll.u32 %s4124_s29, 9 }
  0x23   : > { %4163 = sst [smem:[#allocation30_spill]] %s3180_s24  ;;  %s3354_s9 = sshll.u32 %s3188_s26, 13 }
  0x24   : > { %4164 = sst [smem:[#allocation31_spill]] %s3184_s25  ;;  %s4166_s3 = sld [smem:[#allocation41_spill]] }
  0x25   : > { %4165 = sst [smem:[#allocation32_spill]] %s3188_s26  ;;  %s319_s13 = scalar_lea.vmem [#allocation9], %s3351_s30 }
  0x26   : > { %s326_s14 = sshll.u32 %s319_s13, 4  ;;  %p3365_p7 = pnand %p4129_p5, %p125_p6  ;;  %s3369_s14 = int_to_ptr.vmem [resolvable:$true] %s326_s14 }
  0x27   : > { %s4168_s29 = sand.u32 1, %s3192_s27  }
  0x28   : > { %s4167_s28 = scalar_select %p3365_p7, 1, 0 }
  0x29   : > { %s3373_s7 = scalar_lea.sflag [#allocation10], %s4168_s29  ;;  %p3379_p9 = pneg %p3365_p7 }
  0x2a   : > { %s3360_s12 = scalar_lea.hbm %s4166_s3, %s3354_s9  ;;  %s2859_s2 = scalar_lea.hbm %s4166_s3, 16384 }
  0x2b   : > { %s2854_s10 = scalar_lea.hbm %s3360_s12, 8192  ;;  %p2860_p12 = scmp.lt.u32.totalorder %s3360_s12, %s4166_s3 }
  0x2c   : > { %p2855_p8 = scmp.ne.s32.totalorder %s3360_s12, %s2854_s10  ;;  %p2861_p13 = scmp.lt.u32.totalorder %s2859_s2, %s2854_s10 }
  0x2d   : > { %p2863_p1 = scmp.lt.u32.totalorder %s2854_s10, %s3360_s12 }
  0x2e   : > { %p2857_p10 = pnand %p3379_p9, %p2855_p8  ;;  %p2862_p0 = por %p2861_p13, %p2860_p12 }
  0x30   : > { %p2858_p11 = pneg %p2857_p10  ;;  %p2864_p2 = por %p2863_p1, %p2862_p0 }
  0x32   : > { %p2865_p4 = pnand %p2864_p2, %p2858_p11 }
  0x34   : > { %2868 = shalt.err (!%p2865_p4)
}
  0x35   : > { %s2869_s29 = scalar_lea.vmem %s3369_s14, 8192  ;;  %s3195_s8 = smov [#allocation9]  }
  0x36   : > { %p2870_p6 = scmp.ne.s32.totalorder %s3369_s14, %s2869_s29  ;;  %s2874_s13 = sshll.u32 %s3195_s8, 4  ;;  %s2875_s13 = int_to_ptr.vmem [resolvable:$false] %s2874_s13 }
  0x37   : > { %s2876_s23 = scalar_lea.vmem %s2875_s13, 16384  ;;  %p2877_p5 = scmp.lt.s32.totalorder %s3369_s14, %s2875_s13 }
  0x38   : > { %p2872_p8 = pnand %p2870_p6, %p3379_p9  ;;  %p2878_p3 = scmp.lt.s32.totalorder %s2876_s23, %s2869_s29 }
  0x3a   : > { %p2873_p10 = pneg %p2872_p8  ;;  %p2879_p12 = por %p2878_p3, %p2877_p5 }
  0x3c   : > { %p2880_p13 = pnand %p2879_p12, %p2873_p10 }
  0x3e   : > { %2883 = shalt.err (!%p2880_p13)
}
  0x3f   : > { %s4131_s2 = smov 512   ;;  %s4132_s24 = smov 32  }
  0x40   : > { %2680 = dma.hbm_to_vmem [thread:$0]  (!%p3365_p7), %s3360_s12, 8192, %s3369_s14, %s3373_s7, %s4131_s2, %s4131_s2, %s4132_s24  }
  0x41   : > { %p2229_p3 = scmp.ge.s32.totalorder %s3192_s27, 1  ;;  %p397_p5 = scmp.lt.s32.totalorder %s3192_s27, 5 }
  0x42   : > { %s4172_s5 = sld [smem:[#allocation42_spill]]  ;;  %s361_s23 = scalar_lea.vmem [#allocation12], %s3351_s30 }
  0x43   : > { %p3408_p11 = pnand %p2229_p3, %p397_p5  ;;  %s368_s3 = sshll.u32 %s361_s23, 4  ;;  %s3419_s3 = int_to_ptr.vmem [resolvable:$true] %s368_s3 }
  0x44   : > { %s4173_s12 = sand.u32 1, %s3192_s27  }
  0x45   : > { %s4170_s10 = scalar_select %p3408_p11, 1, 0 }
  0x46   : > { %s3423_s14 = scalar_lea.sflag [#allocation13], %s4173_s12 }
  0x47   : > { %4171 = sst [smem:[#allocation33_spill]] %s4170_s10 }
  0x48   : > { %s3416_s13 = scalar_lea.hbm %s4172_s5, %s3354_s9  ;;  %s2889_s8 = scalar_lea.hbm %s4172_s5, 16384 }
  0x49   : > { %s2884_s2 = scalar_lea.hbm %s3416_s13, 8192  ;;  %p2890_p4 = scmp.lt.u32.totalorder %s3416_s13, %s4172_s5 }
  0x4a   : > { %p2885_p0 = scmp.ne.s32.totalorder %s3416_s13, %s2884_s2  ;;  %p2891_p6 = scmp.lt.u32.totalorder %s2889_s8, %s2884_s2 }
  0x4b   : > { %p2893_p10 = scmp.lt.u32.totalorder %s2884_s2, %s3416_s13 }
  0x4c   : > { %p2887_p1 = pnand %p2885_p0, %p3379_p9  ;;  %p2892_p8 = por %p2891_p6, %p2890_p4 }
  0x4e   : > { %p2888_p2 = pneg %p2887_p1  ;;  %p2894_p12 = por %p2893_p10, %p2892_p8 }
  0x50   : > { %p2895_p13 = pnand %p2894_p12, %p2888_p2 }
  0x52   : > { %2898 = shalt.err (!%p2895_p13)
}
  0x53   : > { %s2899_s23 = scalar_lea.vmem %s3419_s3, 8192  ;;  %s3198_s24 = smov [#allocation12]  }
  0x54   : > { %p2900_p3 = scmp.ne.s32.totalorder %s3419_s3, %s2899_s23  ;;  %s2904_s12 = sshll.u32 %s3198_s24, 4  ;;  %s2905_s12 = int_to_ptr.vmem [resolvable:$false] %s2904_s12 }
  0x55   : > { %s2906_s6 = scalar_lea.vmem %s2905_s12, 16384  ;;  %p2907_p1 = scmp.lt.s32.totalorder %s3419_s3, %s2905_s12 }
  0x56   : > { %p2902_p5 = pnand %p2900_p3, %p3379_p9  ;;  %p2908_p11 = scmp.lt.s32.totalorder %s2906_s6, %s2899_s23 }
  0x58   : > { %p2903_p0 = pneg %p2902_p5  ;;  %p2909_p4 = por %p2908_p11, %p2907_p1 }
  0x5a   : > { %p2910_p6 = pnand %p2909_p4, %p2903_p0 }
  0x5c   : > { %2913 = shalt.err (!%p2910_p6)
}
  0x5d   : > { %s4174_s2 = smov 32   ;;  %s4175_s10 = smov 512  }
  0x5e   : > { %2686 = dma.hbm_to_vmem [thread:$0]  (!%p3365_p7), %s3416_s13, 8192, %s3419_s3, %s3423_s14, %s4175_s10, %s4175_s10, %s4174_s2  }
  0x5f   : > { %s3451_s29 = sadd.s32 4294967295, %s3192_s27   ;;  %s53_s23 = sadd.s32 1, %s3184_s25 }
  0x60   : > { %s57_s24 = sadd.s32 1, %s3188_s26  ;;  %p55_p11 = scmp.ge.s32.totalorder %s53_s23, 2 }
  0x61   : > { %s64_s12 = sadd.s32 1, %s3172_s22  ;;  %p71_p2 = scmp.ne.s32.totalorder %s3172_s22, %s3168_s21 }
  0x62   : > { %p77_p8 = scmp.ne.s32.totalorder %s3168_s21, %s3164_s20  ;;  %s4228_s23 = smov (%p55_p11, %s53_s23), 0 }
  0x63   : > { %4176 = sst [smem:[#allocation34_spill]] %s4228_s23  ;;  %s4230_s24 = smov (!%p55_p11, %s57_s24), %s3188_s26 }
  0x64   : > { %s61_s3 = ssub.s32 %s3184_s25, %s4228_s23  ;;  %p4177_p10 = scmp.eq.s32.totalorder %s3192_s27, 0 }
  0x65   : > { %p59_p13 = scmp.ge.s32.totalorder %s4230_s24, 2  ;;  %p62_p3 = scmp.eq.s32.totalorder %s61_s3, 0 }
  0x66   : > { %p3468_p12 = por %p4177_p10, %p71_p2  ;;  %p78_p5 = scmp.eq.s32.totalorder %s3451_s29, 0 }
  0x67   : > { %s116_s20 = sadd.s32 1, %s3160_s19  ;;  %s4232_s24 = smov (%p59_p13, %s4230_s24), 0 }
  0x68   : > { %4179 = sst [smem:[#allocation35_spill]] %s4232_s24  ;;  %p3479_p0 = por %p78_p5, %p77_p8 }
  0x69   : > { %s3477_s6 = scalar_select %p62_p3, %s3172_s22, %s64_s12  }
  0x6a   : > { %s4181_s2 = scalar_select %p3479_p0, 1, 0 }
  0x6b   : > { %4180 = sst [smem:[#allocation36_spill]] %s3477_s6  ;;  %s113_s10 = ssub.s32 %s3188_s26, %s4232_s24 }
  0x6c   : > { %p114_p1 = scmp.eq.s32.totalorder %s113_s10, 0  ;;  %p129_p4 = scmp.ne.s32.totalorder %s3156_s18, %s3152_s0 }
  0x6d   : > { %s219_s8 = sor.u32 %s113_s10, %s61_s3  ;;  %s224_s5 = sadd.s32 1, %s3148_s17 }
  0x6e   : > { %s3489_s23 = scalar_select %p114_p1, %s3160_s19, %s116_s20  }
  0x6f   : > { %p3491_p6 = por %p129_p4, %p78_p5  ;;  %p222_p11 = scmp.eq.s32.totalorder %s219_s8, 0 }
  0x70   : > { %4182 = sst [smem:[#allocation37_spill]] %s3489_s23  ;;  %p234_p2 = scmp.ne.s32.totalorder %s3148_s17, %s3144_s16 }
  0x71   : > { %s4183_s21 = scalar_select %p3491_p6, 1, 0 }
  0x72   : > { %p235_p8 = scmp.eq.s32.totalorder %s3451_s29, 3  ;;  %p240_p13 = scmp.ne.s32.totalorder %s3144_s16, %s3140_s15 }
  0x73   : > { %4184 = sst [smem:[#allocation38_spill]] %s4183_s21  ;;  %s4187_s0 = sadd.s32 4294967294, %s3192_s27  }
  0x74   : > { %s3499_s12 = scalar_select %p222_p11, %s3148_s17, %s224_s5  }
  0x75   : > { %p3501_p10 = por %p235_p8, %p234_p2  ;;  %p241_p3 = scmp.eq.s32.totalorder %s4187_s0, 3 }
  0x76   : > { %4185 = sst [smem:[#allocation39_spill]] %s3499_s12  ;;  %s291_s3 = sand.u32 1, %s3172_s22  }
  0x77   : > { %s4186_s24 = scalar_select %p3501_p10, 1, 0 }
  0x78   : > { %s2215_s20 = sshll.u32 %s291_s3, 3  ;;  %p3510_p5 = por %p241_p3, %p240_p13 }
  0x79   : > { %s2216_s8 = sshll.u32 %s3184_s25, 7  ;;  %s295_s6 = scalar_lea.vmem [#allocation6], %s2215_s20 }
  0x7a   : > { %s4188_s10 = scalar_select %p3510_p5, 1, 0 }
  0x7b   : > { %s302_s23 = sshll.u32 %s295_s6, 4  ;;  %s3518_s5 = scalar_lea.hbm %s4116_s1, %s2216_s8  ;;  %s3520_s23 = int_to_ptr.vmem [resolvable:$true] %s302_s23 }
  0x7c   : > { %p4189_p1 = scmp.lt.s32.totalorder %s3192_s27, 4  ;;  %s4191_s25 = sand.u32 1, %s3160_s19  }
  0x7d   : > { %s3532_s6 = sshll.u32 %s4191_s25, 7  ;;  %s2263_s18 = sshll.u32 %s3188_s26, 11 }
  0x7e   : > { %p3526_p4 = pnand %p4189_p1, %p3468_p12  ;;  %s3538_s8 = scalar_lea.hbm %s4119_s4, %s2263_s18 }
  0x7f   : > { %s292_s22 = scalar_lea.sflag [#allocation7], %s291_s3  ;;  %s2914_s12 = scalar_lea.hbm %s3518_s5, 128 }
  0x80   : > { %p2915_p11 = scmp.ne.s32.totalorder %s3518_s5, %s2914_s12  ;;  %p2916_p2 = pneg %p3526_p4 }
  0x81   : > { %s2919_s25 = scalar_lea.hbm %s4116_s1, 256  ;;  %p2920_p13 = scmp.lt.u32.totalorder %s3518_s5, %s4116_s1 }
  0x82   : > { %p2917_p12 = pnand %p2916_p2, %p2915_p11  ;;  %p2921_p3 = scmp.lt.u32.totalorder %s2919_s25, %s2914_s12 }
  0x83   : > { %p2923_p5 = scmp.lt.u32.totalorder %s2914_s12, %s3518_s5 }
  0x84   : > { %p2918_p8 = pneg %p2917_p12  ;;  %p2922_p1 = por %p2921_p3, %p2920_p13 }
  0x86   : > { %p2924_p10 = por %p2923_p5, %p2922_p1 }
  0x88   : > { %p2925_p6 = pnand %p2924_p10, %p2918_p8 }
  0x8a   : > { %2928 = shalt.err (!%p2925_p6)
}
  0x8b   : > { %s2929_s3 = scalar_lea.vmem %s3520_s23, 128  ;;  %s3199_s19 = smov [#allocation6]  }
  0x8c   : > { %p2930_p11 = scmp.ne.s32.totalorder %s3520_s23, %s2929_s3  ;;  %s2934_s18 = sshll.u32 %s3199_s19, 4  ;;  %s2935_s18 = int_to_ptr.vmem [resolvable:$false] %s2934_s18 }
  0x8d   : > { %s2936_s17 = scalar_lea.vmem %s2935_s18, 256  ;;  %p2937_p7 = scmp.lt.s32.totalorder %s3520_s23, %s2935_s18 }
  0x8e   : > { %p2932_p12 = pnand %p2930_p11, %p2916_p2  ;;  %p2938_p13 = scmp.lt.s32.totalorder %s2936_s17, %s2929_s3 }
  0x90   : > { %p2933_p0 = pneg %p2932_p12  ;;  %p2939_p3 = por %p2938_p13, %p2937_p7 }
  0x92   : > { %p2940_p5 = pnand %p2939_p3, %p2933_p0 }
  0x94   : > { %2943 = shalt.err (!%p2940_p5)
}
  0x95   : > { %2677 = dma.hbm_to_vmem [thread:$0]  (!%p3526_p4), %s3518_s5, 128, %s3520_s23, %s292_s22  }
  0x96   : > { %s340_s26 = scalar_lea.vmem [#allocation11], %s3532_s6  ;;  %s2944_s21 = scalar_lea.hbm %s3538_s8, 2048 }
  0x97   : > { %s347_s12 = sshll.u32 %s340_s26, 4  ;;  %p2945_p6 = scmp.ne.s32.totalorder %s3538_s8, %s2944_s21  ;;  %s3566_s12 = int_to_ptr.vmem [resolvable:$true] %s347_s12 }
  0x98   : > { %s2949_s13 = scalar_lea.hbm %s4119_s4, 4096  ;;  %p2950_p10 = scmp.lt.u32.totalorder %s3538_s8, %s4119_s4 }
  0x99   : > { %p2947_p7 = pnand %p2945_p6, %p3379_p9  ;;  %p2951_p2 = scmp.lt.u32.totalorder %s2949_s13, %s2944_s21 }
  0x9a   : > { %p2953_p4 = scmp.lt.u32.totalorder %s2944_s21, %s3538_s8 }
  0x9b   : > { %p2948_p0 = pneg %p2947_p7  ;;  %p2952_p8 = por %p2951_p2, %p2950_p10 }
  0x9d   : > { %p2954_p1 = por %p2953_p4, %p2952_p8 }
  0x9f   : > { %p2955_p11 = pnand %p2954_p1, %p2948_p0 }
  0xa1   : > { %2958 = shalt.err (!%p2955_p11)
}
  0xa2   : > { %s2959_s22 = scalar_lea.vmem %s3566_s12, 2048  ;;  %s3200_s23 = smov [#allocation11]  }
  0xa3   : > { %p2960_p12 = scmp.ne.s32.totalorder %s3566_s12, %s2959_s22  ;;  %s2964_s5 = sshll.u32 %s3200_s23, 4  ;;  %s2965_s5 = int_to_ptr.vmem [resolvable:$false] %s2964_s5 }
  0xa4   : > { %s2966_s6 = scalar_lea.vmem %s2965_s5, 4096  ;;  %p2967_p5 = scmp.lt.s32.totalorder %s3566_s12, %s2965_s5 }
  0xa5   : > { %p2962_p13 = pnand %p2960_p12, %p3379_p9  ;;  %p2968_p6 = scmp.lt.s32.totalorder %s2966_s6, %s2959_s22 }
  0xa7   : > { %p2963_p3 = pneg %p2962_p13  ;;  %p2969_p7 = por %p2968_p6, %p2967_p5 }
  0xa9   : > { %p2970_p10 = pnand %p2969_p7, %p2963_p3 }
  0xab   : > { %2973 = shalt.err (!%p2970_p10)
}
  0xac   : > { %s3201_s19 = smov 128   ;;  %s3202_s18 = smov 8  }
  0xad   : > { %p4192_p0 = scmp.ne.s32.totalorder %s4167_s28, 0  ;;  %s4193_s21 = sld [smem:[#allocation43_spill]] }
  0xae   : > { %s382_s0 = scalar_lea.vmem [#allocation14], %s3351_s30 }
  0xaf   : > { %2683 = dma.hbm_to_vmem [thread:$0]  (!%p4192_p0), %s3538_s8, 2048, %s3566_s12, %s3373_s7, %s3201_s19, %s3201_s19, %s3202_s18  }
  0xb0   : > { %s389_s25 = sshll.u32 %s382_s0, 4  ;;  %s3600_s25 = int_to_ptr.vmem [resolvable:$true] %s389_s25 }
  0xb3   : > { %s4194_s13 = smov %s4193_s21  ;;  %s3597_s20 = scalar_lea.hbm %s4193_s21, %s3354_s9 }
  0xb4   : > { %s2974_s3 = scalar_lea.hbm %s3597_s20, 8192  ;;  %s2979_s8 = scalar_lea.hbm %s4194_s13, 16384 }
  0xb5   : > { %p2975_p2 = scmp.ne.s32.totalorder %s3597_s20, %s2974_s3  ;;  %p2980_p1 = scmp.lt.u32.totalorder %s3597_s20, %s4194_s13 }
  0xb6   : > { %p2981_p11 = scmp.lt.u32.totalorder %s2979_s8, %s2974_s3  ;;  %p2983_p13 = scmp.lt.u32.totalorder %s2974_s3, %s3597_s20 }
  0xb7   : > { %p2977_p8 = pnand %p2975_p2, %p3379_p9 }
  0xb8   : > { %p2982_p12 = por %p2981_p11, %p2980_p1 }
  0xb9   : > { %p2978_p4 = pneg %p2977_p8 }
  0xba   : > { %p2984_p3 = por %p2983_p13, %p2982_p12 }
  0xbc   : > { %p2985_p5 = pnand %p2984_p3, %p2978_p4 }
  0xbe   : > { %2988 = shalt.err (!%p2985_p5)
}
  0xbf   : > { %s2989_s30 = scalar_lea.vmem %s3600_s25, 8192  ;;  %s3203_s23 = smov [#allocation14]  }
  0xc0   : > { %p2990_p6 = scmp.ne.s32.totalorder %s3600_s25, %s2989_s30  ;;  %s2994_s5 = sshll.u32 %s3203_s23, 4  ;;  %s2995_s5 = int_to_ptr.vmem [resolvable:$false] %s2994_s5 }
  0xc1   : > { %s2996_s6 = scalar_lea.vmem %s2995_s5, 16384  ;;  %p2997_p2 = scmp.lt.s32.totalorder %s3600_s25, %s2995_s5 }
  0xc2   : > { %p2992_p7 = pnand %p2990_p6, %p3379_p9  ;;  %p2998_p8 = scmp.lt.s32.totalorder %s2996_s6, %s2989_s30 }
  0xc4   : > { %p2993_p10 = pneg %p2992_p7  ;;  %p2999_p1 = por %p2998_p8, %p2997_p2 }
  0xc6   : > { %p3000_p11 = pnand %p2999_p1, %p2993_p10 }
  0xc8   : > { %3003 = shalt.err (!%p3000_p11)
}
  0xc9   : > { %2689 = dma.hbm_to_vmem [thread:$0]  (!%p4192_p0), %s3597_s20, 8192, %s3600_s25, %s3423_s14, %s3201_s19, %s3201_s19, %s3202_s18  }
  0xca   : > { %s4195_s11 = sld [smem:[#allocation33_spill]] }
  0xd0   : > { %p4196_p9 = scmp.ne.s32.totalorder %s4195_s11, 0 }
  0xd1   : > { %s4197_s17 = sld [smem:[#allocation27_spill]] (!%p4196_p9)  ;;  %p4198_p4 = scmp.ne.s32.totalorder (!%p4196_p9), %s4181_s2, 0 }
  0xd2   : > { %401 = sbr.rel (%p4196_p9) target bundleno = 4219 (0x107b), region = 44 }
  0xd7   : > { %s403_s26 = sand.u32 (!%p4196_p9), 1, %s4197_s17  }
  0xd8   : > { %s3630_s21 = sshll.u32 (!%p4196_p9), %s403_s26, 3  ;;  %s404_s0 = scalar_lea.sflag (!%p4196_p9), [#allocation7], %s403_s26 }
  0xd9   : > { %s407_s3 = scalar_lea.vmem [#allocation6], %s3630_s21 }
  0xda   : > { %3119 = dma.done.wait (%p4198_p4), %s404_s0, 128  }
  0xdb   : > { %3121 = vsyncadd (%p4198_p4), %s404_s0, 4294967168  ;;  %s4199_s28 = sld [smem:[#allocation25_spill]]  ;;  %s4200_s22 = sld [smem:[#allocation38_spill]] }
  0xdc   : > { %s412_s14 = sand.u32 1, %s3451_s29  }
  0xdd   : > { %s413_s20 = scalar_lea.sflag [#allocation10], %s412_s14 }
  0xe1   : > { %s414_s19 = sand.u32 1, %s4199_s28   ;;  %p4201_p0 = scmp.ne.s32.totalorder %s4200_s22, 0 }
  0xe2   : > { %s3639_s18 = sshll.u32 %s414_s19, 9 }
  0xe3   : > { %s3642_s25 = scalar_lea.vmem [#allocation9], %s3639_s18 }
  0xe4   : > { %3123 = dma.done.wait (%p4201_p0), %s413_s20, 10240  }
  0xe5   : > { %3125 = vsyncadd (%p4201_p0), %s413_s20, 4294957056  ;;  %s2232_s2 = sshll.u32 %s414_s19, 7  ;;  %s431_s8 = scalar_lea.sflag [#allocation13], %s412_s14 }
  0xe6   : > { %s3648_s7 = scalar_lea.vmem [#allocation11], %s2232_s2  ;;  %s3651_s12 = scalar_lea.vmem [#allocation12], %s3639_s18 }
  0xe7   : > { %3127 = dma.done.wait (%p4201_p0), %s431_s8, 16384  }
  0xe8   : > { %3129 = vsyncadd (%p4201_p0), %s431_s8, 4294950912  ;;  %v3204_v0 = vmov 0.0   ;;  %v516_v1 = vld [vmem:[%s3642_s25 + $0x18] sm:$0xff]  ;;  %v515_v3 = vld [vmem:[%s3642_s25 + $0x10] sm:$0xff]  ;;  %s4202_s29 = sld [smem:[#allocation30_spill]]  ;;  %vm3205_vm0 = vmmov 0  }
  0xe9   : > { %712 = vmatprep.mubr.f32.mxu1 %v3204_v0  ;;  %641 = vmatprep.mubr.f32.mxu0 %v3204_v0  ;;  %v520_v2 = vld [vmem:[%s3642_s25 + $0x38] sm:$0xff]  ;;  %v519_v5 = vld [vmem:[%s3642_s25 + $0x30] sm:$0xff]  ;;  %v514_v6 = vld [vmem:[%s3642_s25 + $0x8] sm:$0xff]  ;;  %s4203_s30 = sld [smem:[#allocation29_spill]]  ;;  %vm740_vm1 = vcmask 261120   ;;  %s3206_s23 = smov 96  }
  0xea   : > { %v2476_v4 = vpack.c.bf16 %v520_v2, %v516_v1  ;;  %v518_v7 = vld [vmem:[%s3642_s25 + $0x28] sm:$0xff]  ;;  %v2478_v8 = vpack.c.bf16 %v519_v5, %v515_v3  ;;  %v513_v10 = vld [vmem:[%s3642_s25] sm:$0xff]  ;;  %v524_v12 = vld [vmem:[%s3642_s25 + $0x58] sm:$0xff]  ;;  %s4204_s17 = sld [smem:[#allocation40_spill]]  ;;  %vm817_vm2 = vcmask 64512   ;;  %s3766_s21 = sand.u32 1, %s3144_s16  }
  0xeb   : > { %v2444_v9 = vpack.c.bf16 %v518_v7, %v514_v6  ;;  %v517_v11 = vld [vmem:[%s3642_s25 + $0x20] sm:$0xff]  ;;  %v528_v14 = vld [vmem:[%s3642_s25 + $0x78] sm:$0xff]  ;;  %v523_v15 = vld [vmem:[%s3642_s25 + $0x50] sm:$0xff]  ;;  %s2236_s0 = sshll.u32 %s3766_s21, 5  ;;  %s3207_s28 = smov 64   ;;  %vm1076_vm3 = vcmask 523520  }
  0xec   : > { %2477 = vmatprep.subr.bf16.mxu1 %v2476_v4  ;;  %v2446_v13 = vpack.c.bf16 %v517_v11, %v513_v10  ;;  %v527_v16 = vld [vmem:[%s3642_s25 + $0x70] sm:$0xff]  ;;  %v2480_v17 = vpack.c.bf16 %v528_v14, %v524_v12  ;;  %v522_v19 = vld [vmem:[%s3642_s25 + $0x48] sm:$0xff]  ;;  %v521_v21 = vld [vmem:[%s3642_s25 + $0x40] sm:$0xff]  ;;  %s3208_s22 = smov 32   ;;  %vm1249_vm4 = vcmask 785920   ;;  %vm1422_vm5 = vcmask 1048320  }
  0xed   : > { %2479 = vmatpush1.bf16.msra.mxu1 %v2478_v8  ;;  %2445 = vmatprep.subr.bf16.mxu0 %v2444_v9  ;;  %v2482_v18 = vpack.c.bf16 %v527_v16, %v523_v15  ;;  %v526_v20 = vld [vmem:[%s3642_s25 + $0x68] sm:$0xff]  ;;  %v525_v23 = vld [vmem:[%s3642_s25 + $0x60] sm:$0xff]  ;;  %v532_v24 = vld [vmem:[%s3642_s25 + $0x98] sm:$0xff]  ;;  %s3925_s14 = scalar_lea.vmem [#allocation14], %s3639_s18  ;;  %p4206_p3 = scmp.ne.s32.totalorder %s4186_s24, 0 }
  0xee   : > { %2447 = vmatpush1.bf16.msra.mxu0 %v2446_v13  ;;  %v2448_v22 = vpack.c.bf16 %v526_v20, %v522_v19  ;;  %v536_v25 = vld [vmem:[%s3642_s25 + $0xb8] sm:$0xff]  ;;  %2481 = vmatprep.subr.bf16.mxu1 %v2480_v17  ;;  %v2450_v26 = vpack.c.bf16 %v525_v23, %v521_v21  ;;  %v531_v28 = vld [vmem:[%s3642_s25 + $0x90] sm:$0xff]  ;;  %v530_v30 = vld [vmem:[%s3642_s25 + $0x88] sm:$0xff]  ;;  %s3712_s9 = sld [smem:[#allocation5 + %s4202_s29]]  ;;  %s2258_s18 = sshll.u32 %s4202_s29, 3 }
  0xef   : > { %v2484_v27 = vpack.c.bf16 %v536_v25, %v532_v24  ;;  %v535_v29 = vld [vmem:[%s3642_s25 + $0xb0] sm:$0xff]  ;;  %v534_v31 = vld [vmem:[%s3642_s25 + $0xa8] sm:$0xff]  ;;  %v529_v32 = vld [vmem:[%s3642_s25 + $0x80] sm:$0xff]  ;;  %p502_p12 = scmp.lt.s32.totalorder %s4203_s30, 1  ;;  %s2257_s19 = sshll.u32 %s4203_s30, 2 }
  0xf0   : > { %2449 = vmatprep.subr.bf16.mxu0 %v2448_v22  ;;  %v533_v33 = vld [vmem:[%s3642_s25 + $0xa0] sm:$0xff]  ;;  %v2486_v34 = vpack.c.bf16 %v535_v29, %v531_v28  ;;  %v2452_v35 = vpack.c.bf16 %v534_v31, %v530_v30  ;;  %v540_v36 = vld [vmem:[%s3642_s25 + $0xd8] sm:$0xff]  ;;  %v539_v38 = vld [vmem:[%s3642_s25 + $0xd0] sm:$0xff]  ;;  %s3210_s6 = smov [#allocation16]  }
  0xf1   : > { %2483 = vmatpush1.bf16.msra.mxu1 %v2482_v18  ;;  %v544_v37 = vld [vmem:[%s3642_s25 + $0xf8] sm:$0xff]  ;;  %v2454_v39 = vpack.c.bf16 %v533_v33, %v529_v32  ;;  %v543_v41 = vld [vmem:[%s3642_s25 + $0xf0] sm:$0xff]  ;;  %v538_v42 = vld [vmem:[%s3642_s25 + $0xc8] sm:$0xff]  ;;  %s503_s5 = scalar_select %p502_p12, %s4203_s30, 1 }
  0xf2   : > { %2451 = vmatpush1.bf16.msra.mxu0 %v2450_v26  ;;  %2485 = vmatprep.subr.bf16.mxu1 %v2484_v27  ;;  %v2488_v40 = vpack.c.bf16 %v544_v37, %v540_v36  ;;  %v542_v43 = vld [vmem:[%s3642_s25 + $0xe8] sm:$0xff]  ;;  %v537_v45 = vld [vmem:[%s3642_s25 + $0xc0] sm:$0xff]  ;;  %v548_v47 = vld [vmem:[%s3642_s25 + $0x118] sm:$0xff]  ;;  %v2490_v49 = vpack.c.bf16 %v543_v41, %v539_v38  ;;  %s3008_s11 = sshll.u32 %s3210_s6, 4  ;;  %s3009_s11 = int_to_ptr.vmem [resolvable:$false] %s3008_s11 }
  0xf3   : > { %2453 = vmatprep.subr.bf16.mxu0 %v2452_v35  ;;  %v2456_v44 = vpack.c.bf16 %v542_v43, %v538_v42  ;;  %v541_v46 = vld [vmem:[%s3642_s25 + $0xe0] sm:$0xff]  ;;  %v552_v48 = vld [vmem:[%s3642_s25 + $0x138] sm:$0xff]  ;;  %v546_v50 = vld [vmem:[%s3642_s25 + $0x108] sm:$0xff]  ;;  %s504_s26 = scalar_lea.vmem %s4204_s17, %s503_s5  ;;  %s3010_s17 = scalar_lea.vmem %s3009_s11, 1024 }
  0xf4   : > { %v550_v51 = vld [vmem:[%s3642_s25 + $0x128] sm:$0xff]  ;;  %v2458_v52 = vpack.c.bf16 %v541_v46, %v537_v45  ;;  %v2492_v53 = vpack.c.bf16 %v552_v48, %v548_v47  ;;  %v547_v54 = vld [vmem:[%s3642_s25 + $0x110] sm:$0xff]  ;;  %v545_v56 = vld [vmem:[%s3642_s25 + $0x100] sm:$0xff] }
  0xf5   : > { %2487 = vmatpush1.bf16.msra.mxu1 %v2486_v34  ;;  %v551_v55 = vld [vmem:[%s3642_s25 + $0x130] sm:$0xff]  ;;  %v2460_v57 = vpack.c.bf16 %v550_v51, %v546_v50  ;;  %v549_v58 = vld [vmem:[%s3642_s25 + $0x120] sm:$0xff]  ;;  %v556_v59 = vld [vmem:[%s3642_s25 + $0x158] sm:$0xff]  ;;  %v511_v34 = vstv %s3712_s9 }
  0xf6   : > { %2455 = vmatpush1.bf16.msra.mxu0 %v2454_v39  ;;  %2489 = vmatprep.subr.bf16.mxu1 %v2488_v40  ;;  %v560_v60 = vld [vmem:[%s3642_s25 + $0x178] sm:$0xff]  ;;  %v554_v61 = vld [vmem:[%s3642_s25 + $0x148] sm:$0xff]  ;;  %v2494_v63 = vpack.c.bf16 %v551_v55, %v547_v54  ;;  %v2462_v1 = vpack.c.bf16 %v549_v58, %v545_v56  ;;  %v555_v3 = vld [vmem:[%s3642_s25 + $0x150] sm:$0xff] }
  0xf7   : > { %2457 = vmatprep.subr.bf16.mxu0 %v2456_v44  ;;  %v558_v62 = vld [vmem:[%s3642_s25 + $0x168] sm:$0xff]  ;;  %v2496_v2 = vpack.c.bf16 %v560_v60, %v556_v59  ;;  %v559_v4 = vld [vmem:[%s3642_s25 + $0x170] sm:$0xff]  ;;  %v553_v5 = vld [vmem:[%s3642_s25 + $0x140] sm:$0xff] }
  0xf8   : > { %v2464_v6 = vpack.c.bf16 %v558_v62, %v554_v61  ;;  %v557_v7 = vld [vmem:[%s3642_s25 + $0x160] sm:$0xff]  ;;  %v564_v8 = vld [vmem:[%s3642_s25 + $0x198] sm:$0xff]  ;;  %v562_v10 = vld [vmem:[%s3642_s25 + $0x188] sm:$0xff]  ;;  %v2498_v12 = vpack.c.bf16 %v559_v4, %v555_v3 }
  0xf9   : > { %2491 = vmatpush1.bf16.msra.mxu1 %v2490_v49  ;;  %v568_v9 = vld [vmem:[%s3642_s25 + $0x1b8] sm:$0xff]  ;;  %v566_v11 = vld [vmem:[%s3642_s25 + $0x1a8] sm:$0xff]  ;;  %v2466_v13 = vpack.c.bf16 %v557_v7, %v553_v5  ;;  %v563_v15 = vld [vmem:[%s3642_s25 + $0x190] sm:$0xff] }
  0xfa   : > { %2459 = vmatpush1.bf16.msra.mxu0 %v2458_v52  ;;  %2493 = vmatprep.subr.bf16.mxu1 %v2492_v53  ;;  %v2500_v14 = vpack.c.bf16 %v568_v9, %v564_v8  ;;  %v567_v16 = vld [vmem:[%s3642_s25 + $0x1b0] sm:$0xff]  ;;  %v561_v17 = vld [vmem:[%s3642_s25 + $0x180] sm:$0xff]  ;;  %v2468_v18 = vpack.c.bf16 %v566_v11, %v562_v10  ;;  %v572_v20 = vld [vmem:[%s3642_s25 + $0x1d8] sm:$0xff] }
  0xfb   : > { %2461 = vmatprep.subr.bf16.mxu0 %v2460_v57  ;;  %v565_v19 = vld [vmem:[%s3642_s25 + $0x1a0] sm:$0xff]  ;;  %v576_v21 = vld [vmem:[%s3642_s25 + $0x1f8] sm:$0xff]  ;;  %v570_v22 = vld [vmem:[%s3642_s25 + $0x1c8] sm:$0xff]  ;;  %v2502_v24 = vpack.c.bf16 %v567_v16, %v563_v15 }
  0xfc   : > { %v574_v23 = vld [vmem:[%s3642_s25 + $0x1e8] sm:$0xff]  ;;  %v2470_v25 = vpack.c.bf16 %v565_v19, %v561_v17  ;;  %v2504_v26 = vpack.c.bf16 %v576_v21, %v572_v20  ;;  %v571_v27 = vld [vmem:[%s3642_s25 + $0x1d0] sm:$0xff]  ;;  %v569_v30 = vld [vmem:[%s3642_s25 + $0x1c0] sm:$0xff] }
  0xfd   : > { %2495 = vmatpush1.bf16.msra.mxu1 %v2494_v63  ;;  %v575_v28 = vld [vmem:[%s3642_s25 + $0x1f0] sm:$0xff]  ;;  %v2472_v29 = vpack.c.bf16 %v574_v23, %v570_v22  ;;  %v573_v31 = vld [vmem:[%s3642_s25 + $0x1e0] sm:$0xff]  ;;  %s1985_s25 = sadd.s32 %s2258_s18, %s2257_s19 }
  0xfe   : > { %2463 = vmatpush1.bf16.msra.mxu0 %v2462_v1  ;;  %2497 = vmatprep.subr.bf16.mxu1 %v2496_v2  ;;  %v2506_v32 = vpack.c.bf16 %v575_v28, %v571_v27  ;;  %v509_v33 = vld [vmem:[%s407_s3] sm:$0xff]  ;;  %v2474_v35 = vpack.c.bf16 %v573_v31, %v569_v30  ;;  %v3760_v41 = vld [vmem:[%s504_s26] ss:$0 sm:$0xff]  ;;  %s3770_s3 = scalar_lea.vmem [#allocation16], %s2236_s0  ;;  %s2259_s2 = sshll.u32 %s1985_s25, 7 }
  0xff   : > { %2465 = vmatprep.subr.bf16.mxu0 %v2464_v6  ;;  %v512_v36 = vmul.f32 %v511_v34, %v509_v33  ;;  %s1988_s20 = sshll.u32 %s3770_s3, 4  ;;  %s4000_s20 = int_to_ptr.vmem [resolvable:$true] %s1988_s20 }
 0x100   : > { %s3004_s5 = scalar_lea.vmem %s4000_s20, 512  ;;  %p3011_p7 = scmp.lt.s32.totalorder %s4000_s20, %s3009_s11 }
 0x101   : > { %2499 = vmatpush1.bf16.msra.mxu1 %v2498_v12  ;;  %p3005_p13 = scmp.ne.s32.totalorder %s4000_s20, %s3004_s5  ;;  %p3012_p10 = scmp.lt.s32.totalorder %s3010_s17, %s3004_s5 }
 0x102   : > { %2467 = vmatpush1.bf16.msra.mxu0 %v2466_v13  ;;  %2501 = vmatprep.subr.bf16.mxu1 %v2500_v14 }
 0x103   : > { %2469 = vmatprep.subr.bf16.mxu0 %v2468_v18  ;;  %p3006_p5 = pnand %p3005_p13, %p4206_p3  ;;  %p3013_p2 = por %p3012_p10, %p3011_p7 }
 0x105   : > { %2503 = vmatpush1.bf16.msra.mxu1 %v2502_v24  ;;  %p3007_p6 = pneg %p3006_p5 }
 0x106   : > { %2471 = vmatpush1.bf16.msra.mxu0 %v2470_v25  ;;  %2505 = vmatprep.subr.bf16.mxu1 %v2504_v26 }
 0x107   : > { %2473 = vmatprep.subr.bf16.mxu0 %v2472_v29  ;;  %p3014_p8 = pnand %p3013_p2, %p3007_p6 }
 0x109   : > { %2507 = vmatpush1.bf16.msra.mxu1 %v2506_v32 }
 0x10a   : > { %2475 = vmatpush1.bf16.msra.mxu0 %v2474_v35  ;;  %2369 = vmatprep.subr.mxu1 %v3204_v0 }
 0x10c   : > { %713 = vmatmul.mubr.f32.vlgmr.msra.gmra.mrb[0].mxu1 %v512_v36 }
 0x10d   : > { %642 = vmatmul.mubr.f32.vlgmr.msra.gmra.mrb[0].mxu0 %v512_v36  ;;  %2371 = vmatprep.mubr.msk.f32.mxu1 %vm3205_vm0, %v3204_v0 }
 0x10e   : > { %2441 = vmatprep.mubr.msk.f32.mxu0 %vm3205_vm0, %v3204_v0 }
 0x1df   : > { %v3734_v37 = vpop.f32.mrb[0].mxu1 }
 0x1e0   : > { %906 = vrot.lane.b32.xlu1 %v3734_v37, %s3206_s23  ;;  %v3738_v38 = vpop.f32.mrb[1].mxu1  ;;  %2370 = vmatpush3.xpose.msk.msra.mxu1 %vm740_vm1, %v3734_v37  ;;  %v3742_v39 = vpop.f32.mrb[0].mxu0 }
 0x1e1   : > { %v3744_v40 = vpop.f32.mrb[1].mxu0  ;;  %2374 = vmatprep.subr.mxu1 %v3204_v0 }
 0x1e3   : > { %2372 = vmatmul.mubr.msk.f32.vlgmr.msra.gmra.mrb[2].mxu1 %vm740_vm1, %v3744_v40 }
 0x1e4   : > { %904 = vrot.lane.b32.xlu1 %v3744_v40, %s3206_s23  ;;  %2375 = vmatpush3.msra.mxu1 %v3738_v38 }
 0x1e5   : > { %2376 = vmatprep.mubr.msk.f32.mxu1 %vm3205_vm0, %v3204_v0  ;;  %2379 = vmatprep.subr.mxu1 %v3204_v0 }
 0x252   : > { %v907_v53 = vpop.permute.xlu1 %906 }
 0x256   : > { %v905_v55 = vpop.permute.xlu1 %904 }
 0x2b6   : > { %v813_v42 = vpop.f32.mrb[2].mxu1 }
 0x2b7   : > { %v814_v43 = vadd.f32 %v3760_v41, %v813_v42  ;;  %v2373_v44 = vpop.f32.mrb[3].mxu1 }
 0x2b9   : > { %v818_v45 = vsel %vm817_vm2, %v814_v43, -inf }
 0x2ba   : > { %819 = vmax.xlane.f32.xlu0 %v818_v45  ;;  %v1425_v45 = vld [vmem:[%s3648_s7] sm:$0xff] }
 0x347   : > { %v820_v46 = vpop.xlane.xlu0 %819 }
 0x348   : > { %v821_v47 = vsub.f32 %v814_v43, %v820_v46  ;;  %v1426_v46 = vld [vmem:[%s3648_s7 + $0x8] sm:$0xff] }
 0x34a   : > { %v822_v48 = vmul.f32 1.442695, %v821_v47  ;;  %v1427_v47 = vld [vmem:[%s3648_s7 + $0x10] sm:$0xff] }
 0x34c   : > { %2824 = vpow2.f32 %v822_v48  ;;  %v3209_v48 = vmov 0.0|0.0  }
 0x34d   : > { %2508 = vmatprep.subr.bf16.mxu0 %v3209_v48 }
 0x356   : > { %v2825_v49 = vpop.eup %2824 }
 0x357   : > { %v824_v50 = vsel %vm817_vm2, %v2825_v49, 0.0 }
 0x358   : > { %825 = vadd.xlane.f32.xlu0 %v824_v50  ;;  %v1428_v50 = vld [vmem:[%s3648_s7 + $0x18] sm:$0xff] }
 0x3e5   : > { %v826_v51 = vpop.xlane.xlu0 %825 }
 0x3e6   : > { %2826 = vrcp.f32 %v826_v51  ;;  %v2512_v51 = vpack.c.bf16 %v1428_v50, %v1427_v47  ;;  %v1551_v50 = vld [vmem:[%s3651_s12 + $0xd8] sm:$0xff] }
 0x3f0   : > { %v2827_v52 = vpop.eup %2826 }
 0x3f1   : > { %v828_v54 = vmul.f32 %v2827_v52, %v2825_v49  ;;  %v2509_v49 = vpack.c.bf16 %v1426_v46, %v1425_v45  ;;  %v1429_v52 = vld [vmem:[%s3648_s7 + $0x20] sm:$0xff]  ;;  %v1542_v45 = vld [vmem:[%s3651_s12 + $0x90] sm:$0xff] }
 0x3f2   : > { %v1546_v46 = vld [vmem:[%s3651_s12 + $0xb0] sm:$0xff] }
 0x3f3   : > { %2377 = vmatmul.mubr.msk.f32.vlgmr.msra.gmra.mrb[4].mxu1 %vm817_vm2, %v828_v54  ;;  %829 = vst.msk [vmem:[%s3770_s3] sm:$0xff] %vm817_vm2, %v828_v54  ;;  %2510 = vmatpush3.bf16.msra.mxu0 %v2509_v49  ;;  %v1553_v49 = vld [vmem:[%s3651_s12 + $0xe8] sm:$0xff] }
 0x3f4   : > { %2380 = vmatpush3.xpose.msk.msra.mxu1 %vm740_vm1, %v907_v53  ;;  %2381 = vmatprep.mubr.msk.f32.mxu1 %vm3205_vm0, %v3204_v0  ;;  %v1430_v53 = vld [vmem:[%s3648_s7 + $0x28] sm:$0xff] }
 0x3f5   : > { %2384 = vmatprep.subr.mxu1 %v3204_v0  ;;  %2511 = vmatprep.subr.bf16.mxu0 %v3209_v48  ;;  %v2515_v54 = vpack.c.bf16 %v1430_v53, %v1429_v52  ;;  %v1555_v53 = vld [vmem:[%s3651_s12 + $0xf8] sm:$0xff] }
 0x3f7   : > { %2382 = vmatmul.mubr.msk.f32.vlgmr.msra.gmra.mrb[6].mxu1 %vm740_vm1, %v905_v55  ;;  %2513 = vmatpush3.bf16.msra.mxu0 %v2512_v51  ;;  %v1431_v55 = vld [vmem:[%s3648_s7 + $0x30] sm:$0xff]  ;;  %v2574_v51 = vpack.c.bf16 %v1546_v46, %v1542_v45 }
 0x3f8   : > { %2386 = vmatprep.mubr.msk.f32.mxu1 %vm3205_vm0, %v3204_v0  ;;  %2514 = vmatprep.subr.bf16.mxu0 %v3209_v48  ;;  %v1582_v45 = vld [vmem:[%s3651_s12 + $0x1d0] sm:$0xff] }
 0x3f9   : > { %v1586_v46 = vld [vmem:[%s3651_s12 + $0x1f0] sm:$0xff] }
 0x3fb   : > { %2516 = vmatpush3.bf16.msra.mxu0 %v2515_v54  ;;  %v1548_v54 = vld [vmem:[%s3651_s12 + $0xc0] sm:$0xff] }
 0x3fc   : > { %2517 = vmatprep.subr.bf16.mxu0 %v3209_v48 }
 0x4c6   : > { %v899_v56 = vpop.f32.mrb[4].mxu1 }
 0x4c7   : > { %903 = vst.msk [vmem:[#allocation3] sm:$0xff] %vm740_vm1, %v899_v56  ;;  %v2378_v57 = vpop.f32.mrb[5].mxu1  ;;  %v1432_v56 = vld [vmem:[%s3648_s7 + $0x38] sm:$0xff] }
 0x4c8   : > { %v2518_v57 = vpack.c.bf16 %v1432_v56, %v1431_v55  ;;  %v1552_v55 = vld [vmem:[%s3651_s12 + $0xe0] sm:$0xff]  ;;  %v2576_v56 = vpack.c.bf16 %v1555_v53, %v1551_v50  ;;  %v1751_v50 = vld [vmem:[%s3925_s14 + $0x88] sm:$0xff] }
 0x4c9   : > { %v1783_v53 = vld [vmem:[%s3925_s14 + $0x188] sm:$0xff] }
 0x4ca   : > { %v978_v58 = vpop.f32.mrb[6].mxu1  ;;  %2519 = vmatpush3.bf16.msra.mxu0 %v2518_v57  ;;  %v1550_v57 = vld [vmem:[%s3651_s12 + $0xd0] sm:$0xff] }
 0x4cb   : > { %v979_v59 = vadd.f32 %v3760_v41, %v978_v58  ;;  %v2383_v60 = vpop.f32.mrb[7].mxu1  ;;  %v1433_v58 = vld [vmem:[%s3648_s7 + $0x40] sm:$0xff]  ;;  %2520 = vmatprep.subr.bf16.mxu0 %v3209_v48 }
 0x4cd   : > { %v982_v61 = vsel %vm817_vm2, %v979_v59, -inf }
 0x4ce   : > { %983 = vmax.xlane.f32.xlu0 %v982_v61  ;;  %v1435_v61 = vld [vmem:[%s3648_s7 + $0x50] sm:$0xff] }
 0x4e4   : > { %996 = vrot.lane.b32.xlu0 %v3738_v38, %s3206_s23 }
 0x4e8   : > { %1080 = vrot.lane.b32.xlu0 %v3734_v37, %s3207_s28 }
 0x4ec   : > { %1078 = vrot.lane.b32.xlu0 %v3744_v40, %s3207_s28 }
 0x55b   : > { %v984_v62 = vpop.xlane.xlu0 %983 }
 0x55c   : > { %v985_v63 = vsub.f32 %v979_v59, %v984_v62  ;;  %v1434_v59 = vld [vmem:[%s3648_s7 + $0x48] sm:$0xff]  ;;  %v1436_v62 = vld [vmem:[%s3648_s7 + $0x58] sm:$0xff] }
 0x55d   : > { %v2521_v60 = vpack.c.bf16 %v1434_v59, %v1433_v58  ;;  %v1554_v58 = vld [vmem:[%s3651_s12 + $0xf0] sm:$0xff]  ;;  %v2546_v59 = vpack.c.bf16 %v1552_v55, %v1548_v54 }
 0x55e   : > { %v986_v1 = vmul.f32 1.442695, %v985_v63  ;;  %v2524_v63 = vpack.c.bf16 %v1436_v62, %v1435_v61 }
 0x55f   : > { %v997_v2 = vpop.permute.xlu0 %996  ;;  %2522 = vmatpush3.bf16.msra.mxu0 %v2521_v60  ;;  %v2578_v60 = vpack.c.bf16 %v1554_v58, %v1550_v57  ;;  %v1734_v58 = vld [vmem:[%s3925_s14] sm:$0xff] }
 0x560   : > { %2828 = vpow2.f32 %v986_v1  ;;  %2385 = vmatpush3.msra.mxu1 %v997_v2  ;;  %2523 = vmatprep.subr.bf16.mxu0 %v3209_v48  ;;  %v1437_v1 = vld [vmem:[%s3648_s7 + $0x60] sm:$0xff]  ;;  %v1438_v2 = vld [vmem:[%s3648_s7 + $0x68] sm:$0xff] }
 0x561   : > { %2389 = vmatprep.subr.mxu1 %v3204_v0 }
 0x563   : > { %v1081_v7 = vpop.permute.xlu0 %1080  ;;  %2525 = vmatpush3.bf16.msra.mxu0 %v2524_v63 }
 0x564   : > { %2526 = vmatprep.subr.bf16.mxu0 %v3209_v48 }
 0x567   : > { %v1079_v9 = vpop.permute.xlu0 %1078 }
 0x56a   : > { %v2829_v3 = vpop.eup %2828 }
 0x56b   : > { %v988_v4 = vsel %vm817_vm2, %v2829_v3, 0.0 }
 0x56c   : > { %989 = vadd.xlane.f32.xlu1 %v988_v4  ;;  %v1439_v4 = vld [vmem:[%s3648_s7 + $0x70] sm:$0xff] }
 0x57d   : > { %1169 = vrot.lane.b32.xlu1 %v3738_v38, %s3207_s28 }
 0x581   : > { %1253 = vrot.lane.b32.xlu1 %v3734_v37, %s3208_s22 }
 0x5f9   : > { %v990_v5 = vpop.xlane.xlu1 %989 }
 0x5fa   : > { %2830 = vrcp.f32 %v990_v5  ;;  %v1440_v5 = vld [vmem:[%s3648_s7 + $0x78] sm:$0xff] }
 0x5fd   : > { %v1170_v10 = vpop.permute.xlu1 %1169 }
 0x601   : > { %v1254_v22 = vpop.permute.xlu1 %1253 }
 0x604   : > { %v2831_v6 = vpop.eup %2830 }
 0x605   : > { %v992_v8 = vmul.f32 %v2831_v6, %v2829_v3  ;;  %v2527_v3 = vpack.c.bf16 %v1438_v2, %v1437_v1  ;;  %v2530_v6 = vpack.c.bf16 %v1440_v5, %v1439_v4  ;;  %v1557_v2 = vld [vmem:[%s3651_s12 + $0x108] sm:$0xff]  ;;  %v1559_v4 = vld [vmem:[%s3651_s12 + $0x118] sm:$0xff] }
 0x607   : > { %2387 = vmatmul.mubr.msk.f32.vlgmr.msra.gmra.mrb[8].mxu1 %vm817_vm2, %v992_v8  ;;  %2243 = vst.msk [vmem:[%s3770_s3 + $0x8] sm:$0xff] %vm817_vm2, %v992_v8  ;;  %2528 = vmatpush3.bf16.msra.mxu0 %v2527_v3  ;;  %v1561_v3 = vld [vmem:[%s3651_s12 + $0x128] sm:$0xff] }
 0x608   : > { %2390 = vmatpush3.xpose.msk.msra.mxu1 %vm740_vm1, %v1081_v7  ;;  %2391 = vmatprep.mubr.msk.f32.mxu1 %vm3205_vm0, %v3204_v0  ;;  %v2548_v5 = vpack.c.bf16 %v1561_v3, %v1557_v2  ;;  %v1784_v2 = vld [vmem:[%s3925_s14 + $0x190] sm:$0xff]  ;;  %v1785_v3 = vld [vmem:[%s3925_s14 + $0x198] sm:$0xff] }
 0x609   : > { %2394 = vmatprep.subr.mxu1 %v3204_v0  ;;  %2529 = vmatprep.subr.bf16.mxu0 %v3209_v48  ;;  %v1549_v48 = vld [vmem:[%s3651_s12 + $0xc8] sm:$0xff] }
 0x60a   : > { %v2544_v52 = vpack.c.bf16 %v1553_v49, %v1549_v48  ;;  %v2594_v48 = vpack.c.bf16 %v1586_v46, %v1582_v45  ;;  %v1750_v49 = vld [vmem:[%s3925_s14 + $0x80] sm:$0xff] }
 0x60b   : > { %2392 = vmatmul.mubr.msk.f32.vlgmr.msra.gmra.mrb[10].mxu1 %vm740_vm1, %v1079_v9  ;;  %2531 = vmatpush3.bf16.msra.mxu0 %v2530_v6  ;;  %v1563_v6 = vld [vmem:[%s3651_s12 + $0x138] sm:$0xff]  ;;  %v1774_v46 = vld [vmem:[%s3925_s14 + $0x140] sm:$0xff] }
 0x60c   : > { %2395 = vmatpush3.msra.mxu1 %v1170_v10  ;;  %2396 = vmatprep.mubr.msk.f32.mxu1 %vm3205_vm0, %v3204_v0 }
 0x60d   : > { %2399 = vmatprep.subr.mxu1 %v3204_v0 }
 0x6da   : > { %v1068_v11 = vpop.f32.mrb[8].mxu1 }
 0x6db   : > { %v2388_v12 = vpop.f32.mrb[9].mxu1 }
 0x6de   : > { %v1152_v13 = vpop.f32.mrb[10].mxu1 }
 0x6df   : > { %v1153_v14 = vadd.f32 %v3760_v41, %v1152_v13  ;;  %v2393_v15 = vpop.f32.mrb[11].mxu1 }
 0x6e0   : > { %v1529_v15 = vld [vmem:[%s3651_s12 + $0x28] sm:$0xff] }
 0x6e1   : > { %v1156_v16 = vsel %vm817_vm2, %v1153_v14, -inf }
 0x6e2   : > { %1157 = vmax.xlane.f32.xlu0 %v1156_v16  ;;  %v1527_v16 = vld [vmem:[%s3651_s12 + $0x18] sm:$0xff] }
 0x76f   : > { %v1158_v17 = vpop.xlane.xlu0 %1157 }
 0x770   : > { %v1159_v18 = vsub.f32 %v1153_v14, %v1158_v17  ;;  %v1525_v14 = vld [vmem:[%s3651_s12 + $0x8] sm:$0xff] }
 0x771   : > { %v2532_v17 = vpack.c.bf16 %v1529_v15, %v1525_v14  ;;  %v1565_v14 = vld [vmem:[%s3651_s12 + $0x148] sm:$0xff] }
 0x772   : > { %v1160_v19 = vmul.f32 1.442695, %v1159_v18  ;;  %v1531_v18 = vld [vmem:[%s3651_s12 + $0x38] sm:$0xff]  ;;  %v1569_v15 = vld [vmem:[%s3651_s12 + $0x168] sm:$0xff] }
 0x774   : > { %2832 = vpow2.f32 %v1160_v19  ;;  %v1524_v19 = vld [vmem:[%s3651_s12] sm:$0xff] }
 0x77e   : > { %v2833_v20 = vpop.eup %2832 }
 0x77f   : > { %v1162_v21 = vsel %vm817_vm2, %v2833_v20, 0.0 }
 0x780   : > { %1163 = vadd.xlane.f32.xlu1 %v1162_v21 }
 0x791   : > { %1251 = vrot.lane.b32.xlu1 %v3744_v40, %s3208_s22 }
 0x80d   : > { %v1164_v23 = vpop.xlane.xlu1 %1163 }
 0x80e   : > { %2834 = vrcp.f32 %v1164_v23  ;;  %v1533_v23 = vld [vmem:[%s3651_s12 + $0x48] sm:$0xff] }
 0x811   : > { %v1252_v26 = vpop.permute.xlu1 %1251 }
 0x818   : > { %v2835_v24 = vpop.eup %2834 }
 0x819   : > { %v1166_v25 = vmul.f32 %v2835_v24, %v2833_v20  ;;  %v1528_v20 = vld [vmem:[%s3651_s12 + $0x20] sm:$0xff] }
 0x81a   : > { %v2534_v21 = vpack.c.bf16 %v1528_v20, %v1524_v19  ;;  %v1564_v19 = vld [vmem:[%s3651_s12 + $0x140] sm:$0xff] }
 0x81b   : > { %2397 = vmatmul.mubr.msk.f32.vlgmr.msra.gmra.mrb[12].mxu1 %vm817_vm2, %v1166_v25  ;;  %2247 = vst.msk [vmem:[%s3770_s3 + $0x10] sm:$0xff] %vm817_vm2, %v1166_v25  ;;  %v1537_v25 = vld [vmem:[%s3651_s12 + $0x68] sm:$0xff]  ;;  %v1568_v20 = vld [vmem:[%s3651_s12 + $0x160] sm:$0xff] }
 0x81c   : > { %2400 = vmatpush3.xpose.msk.msra.mxu1 %vm740_vm1, %v1254_v22  ;;  %2401 = vmatprep.mubr.msk.f32.mxu1 %vm3205_vm0, %v3204_v0  ;;  %v1530_v22 = vld [vmem:[%s3651_s12 + $0x30] sm:$0xff] }
 0x81d   : > { %2404 = vmatprep.subr.mxu1 %v3204_v0 }
 0x81f   : > { %2402 = vmatmul.mubr.msk.f32.vlgmr.msra.gmra.mrb[14].mxu1 %vm740_vm1, %v1252_v26  ;;  %v1535_v26 = vld [vmem:[%s3651_s12 + $0x58] sm:$0xff] }
 0x820   : > { %2406 = vmatprep.mubr.msk.f32.mxu1 %vm3205_vm0, %v3204_v0 }
 0x8ee   : > { %v1241_v27 = vpop.f32.mrb[12].mxu1 }
 0x8ef   : > { %v2398_v28 = vpop.f32.mrb[13].mxu1 }
 0x8f0   : > { %v2536_v28 = vpack.c.bf16 %v1537_v25, %v1533_v23  ;;  %v1573_v23 = vld [vmem:[%s3651_s12 + $0x188] sm:$0xff] }
 0x8f1   : > { %v1577_v25 = vld [vmem:[%s3651_s12 + $0x1a8] sm:$0xff] }
 0x8f2   : > { %v1325_v29 = vpop.f32.mrb[14].mxu1 }
 0x8f3   : > { %v1326_v30 = vadd.f32 %v3760_v41, %v1325_v29  ;;  %v2403_v31 = vpop.f32.mrb[15].mxu1 }
 0x8f4   : > { %v1536_v31 = vld [vmem:[%s3651_s12 + $0x60] sm:$0xff] }
 0x8f5   : > { %v1329_v32 = vsel %vm817_vm2, %v1326_v30, -inf }
 0x8f6   : > { %1330 = vmax.xlane.f32.xlu0 %v1329_v32  ;;  %v1534_v32 = vld [vmem:[%s3651_s12 + $0x50] sm:$0xff] }
 0x90c   : > { %1342 = vrot.lane.b32.xlu0 %v3738_v38, %s3208_s22 }
 0x910   : > { %1073 = vrot.lane.b32.xlu0 %v1068_v11, %s3208_s22 }
 0x914   : > { %1246 = vrot.lane.b32.xlu0 %v1241_v27, %s3207_s28  ;;  %v1539_v27 = vld [vmem:[%s3651_s12 + $0x78] sm:$0xff] }
 0x915   : > { %v2568_v29 = vpack.c.bf16 %v1539_v27, %v1535_v26  ;;  %v1575_v26 = vld [vmem:[%s3651_s12 + $0x198] sm:$0xff] }
 0x916   : > { %v1579_v27 = vld [vmem:[%s3651_s12 + $0x1b8] sm:$0xff] }
 0x983   : > { %v1331_v33 = vpop.xlane.xlu0 %1330 }
 0x984   : > { %v1332_v34 = vsub.f32 %v1326_v30, %v1331_v33  ;;  %v1532_v30 = vld [vmem:[%s3651_s12 + $0x40] sm:$0xff] }
 0x985   : > { %v2538_v33 = vpack.c.bf16 %v1536_v31, %v1532_v30  ;;  %v1572_v30 = vld [vmem:[%s3651_s12 + $0x180] sm:$0xff] }
 0x986   : > { %v1333_v35 = vmul.f32 1.442695, %v1332_v34  ;;  %v1538_v34 = vld [vmem:[%s3651_s12 + $0x70] sm:$0xff]  ;;  %v1576_v31 = vld [vmem:[%s3651_s12 + $0x1a0] sm:$0xff] }
 0x987   : > { %v1343_v36 = vpop.permute.xlu0 %1342 }
 0x988   : > { %2836 = vpow2.f32 %v1333_v35  ;;  %2405 = vmatpush3.msra.mxu1 %v1343_v36  ;;  %v1541_v35 = vld [vmem:[%s3651_s12 + $0x88] sm:$0xff] }
 0x989   : > { %2533 = vmatprep.subr.bf16.mxu1 %v2532_v17  ;;  %v1545_v36 = vld [vmem:[%s3651_s12 + $0xa8] sm:$0xff]  ;;  %v2552_v17 = vpack.c.bf16 %v1569_v15, %v1565_v14  ;;  %v1754_v14 = vld [vmem:[%s3925_s14 + $0xa0] sm:$0xff] }
 0x98a   : > { %v1755_v15 = vld [vmem:[%s3925_s14 + $0xa8] sm:$0xff] }
 0x98b   : > { %v1074_v37 = vpop.permute.xlu0 %1073 }
 0x98c   : > { %1077 = vst.msk [vmem:[#allocation3] sm:$0xff] %vm1076_vm3, %v1074_v37  ;;  %v2570_v37 = vpack.c.bf16 %v1538_v34, %v1534_v32  ;;  %v1574_v32 = vld [vmem:[%s3651_s12 + $0x190] sm:$0xff] }
 0x98d   : > { %v1578_v34 = vld [vmem:[%s3651_s12 + $0x1b0] sm:$0xff] }
 0x98f   : > { %v1247_v40 = vpop.permute.xlu0 %1246 }
 0x990   : > { %1250 = vst.msk [vmem:[#allocation3] sm:$0xff] %vm1249_vm4, %v1247_v40  ;;  %v2540_v40 = vpack.c.bf16 %v1545_v36, %v1541_v35  ;;  %v1581_v35 = vld [vmem:[%s3651_s12 + $0x1c8] sm:$0xff] }
 0x991   : > { %v1585_v36 = vld [vmem:[%s3651_s12 + $0x1e8] sm:$0xff] }
 0x992   : > { %v2837_v38 = vpop.eup %2836 }
 0x993   : > { %v1335_v41 = vsel %vm817_vm2, %v2837_v38, 0.0 }
 0x994   : > { %1336 = vadd.xlane.f32.xlu1 %v1335_v41  ;;  %v1547_v41 = vld [vmem:[%s3651_s12 + $0xb8] sm:$0xff] }
 0xa21   : > { %v1337_v42 = vpop.xlane.xlu1 %1336 }
 0xa22   : > { %2838 = vrcp.f32 %v1337_v42  ;;  %v1540_v42 = vld [vmem:[%s3651_s12 + $0x80] sm:$0xff] }
 0xa2c   : > { %v2839_v43 = vpop.eup %2838 }
 0xa2d   : > { %v1339_v44 = vmul.f32 %v2839_v43, %v2837_v38  ;;  %v1543_v38 = vld [vmem:[%s3651_s12 + $0x98] sm:$0xff] }
 0xa2e   : > { %v2572_v43 = vpack.c.bf16 %v1547_v41, %v1543_v38  ;;  %v1583_v38 = vld [vmem:[%s3651_s12 + $0x1d8] sm:$0xff] }
 0xa2f   : > { %2407 = vmatmul.mubr.msk.f32.vlgmr.msra.gmra.mrb[16].mxu1 %vm817_vm2, %v1339_v44  ;;  %2251 = vst.msk [vmem:[%s3770_s3 + $0x18] sm:$0xff] %vm817_vm2, %v1339_v44  ;;  %v1544_v44 = vld [vmem:[%s3651_s12 + $0xa0] sm:$0xff]  ;;  %v1587_v41 = vld [vmem:[%s3651_s12 + $0x1f8] sm:$0xff] }
 0xa30   : > { %1652 = vmatprep.mubr.f32.mxu1 %v3204_v0  ;;  %2535 = vmatpush1.bf16.msra.mxu1 %v2534_v21  ;;  %v2542_v47 = vpack.c.bf16 %v1544_v44, %v1540_v42  ;;  %v2554_v21 = vpack.c.bf16 %v1568_v20, %v1564_v19  ;;  %v1580_v42 = vld [vmem:[%s3651_s12 + $0x1c0] sm:$0xff]  ;;  %v1739_v20 = vld [vmem:[%s3925_s14 + $0x28] sm:$0xff] }
 0xa31   : > { %2537 = vmatprep.subr.bf16.mxu1 %v2536_v28  ;;  %v2556_v28 = vpack.c.bf16 %v1577_v25, %v1573_v23  ;;  %v1584_v44 = vld [vmem:[%s3651_s12 + $0x1e0] sm:$0xff]  ;;  %v1756_v23 = vld [vmem:[%s3925_s14 + $0xb0] sm:$0xff] }
 0xa32   : > { %v1738_v19 = vld [vmem:[%s3925_s14 + $0x20] sm:$0xff]  ;;  %v1788_v25 = vld [vmem:[%s3925_s14 + $0x1b0] sm:$0xff] }
 0xa34   : > { %2539 = vmatpush1.bf16.msra.mxu1 %v2538_v33  ;;  %v2558_v33 = vpack.c.bf16 %v1576_v31, %v1572_v30  ;;  %v1741_v30 = vld [vmem:[%s3925_s14 + $0x38] sm:$0xff] }
 0xa35   : > { %2541 = vmatprep.subr.bf16.mxu1 %v2540_v40  ;;  %v2560_v40 = vpack.c.bf16 %v1585_v36, %v1581_v35  ;;  %v1758_v35 = vld [vmem:[%s3925_s14 + $0xc0] sm:$0xff]  ;;  %v1759_v36 = vld [vmem:[%s3925_s14 + $0xc8] sm:$0xff] }
 0xa38   : > { %2543 = vmatpush1.bf16.msra.mxu1 %v2542_v47  ;;  %v2562_v47 = vpack.c.bf16 %v1584_v44, %v1580_v42  ;;  %v1742_v42 = vld [vmem:[%s3925_s14 + $0x40] sm:$0xff]  ;;  %v2612_v44 = vpack.c.bf16 %v1759_v36, %v1758_v35 }
 0xa39   : > { %2545 = vmatprep.subr.bf16.mxu1 %v2544_v52  ;;  %v2596_v52 = vpack.c.bf16 %v1751_v50, %v1750_v49  ;;  %v1761_v49 = vld [vmem:[%s3925_s14 + $0xd8] sm:$0xff]  ;;  %v1792_v50 = vld [vmem:[%s3925_s14 + $0x1d0] sm:$0xff] }
 0xa3c   : > { %2547 = vmatpush1.bf16.msra.mxu1 %v2546_v59  ;;  %v1735_v59 = vld [vmem:[%s3925_s14 + $0x8] sm:$0xff] }
 0xa3d   : > { %2549 = vmatprep.subr.bf16.mxu1 %v2548_v5  ;;  %v2598_v5 = vpack.c.bf16 %v1735_v59, %v1734_v58  ;;  %v1776_v58 = vld [vmem:[%s3925_s14 + $0x150] sm:$0xff]  ;;  %v1777_v59 = vld [vmem:[%s3925_s14 + $0x158] sm:$0xff] }
 0xb02   : > { %v1414_v7 = vpop.f32.mrb[16].mxu1 }
 0xb03   : > { %1419 = vrot.lane.b32.xlu0 %v1414_v7, %s3206_s23  ;;  %v2408_v8 = vpop.f32.mrb[17].mxu1  ;;  %v1556_v7 = vld [vmem:[%s3651_s12 + $0x100] sm:$0xff]  ;;  %s1956_s23 = scalar_lea.sflag [#allocation17], %s3766_s21 }
 0xb04   : > { %v1560_v8 = vld [vmem:[%s3651_s12 + $0x120] sm:$0xff] }
 0xb75   : > { %v1420_v9 = vpop.permute.xlu0 %1419 }
 0xb76   : > { %1423 = vst.msk [vmem:[#allocation3] sm:$0xff] %vm1422_vm5, %v1420_v9  ;;  %v2580_v9 = vpack.c.bf16 %v1563_v6, %v1559_v4 }
 0xb7d   : > { %v1424_v10 = vld [vmem:[#allocation3] sm:$0xff] }
 0xb7e   : > { %2442 = vmatmul.mubr.f32.vlgmr.msra.gmra.mrb[2].mxu0 %v1424_v10  ;;  %v2550_v10 = vpack.c.bf16 %v1560_v8, %v1556_v7  ;;  %v1736_v7 = vld [vmem:[%s3925_s14 + $0x10] sm:$0xff]  ;;  %v1737_v8 = vld [vmem:[%s3925_s14 + $0x18] sm:$0xff] }
 0xb7f   : > { %1723 = vmatprep.mubr.f32.mxu0 %v3204_v0  ;;  %v2564_v0 = vpack.c.bf16 %v1531_v18, %v1527_v16  ;;  %v1567_v16 = vld [vmem:[%s3651_s12 + $0x158] sm:$0xff] }
 0xb80   : > { %2551 = vmatpush1.bf16.msra.mxu1 %v2550_v10  ;;  %v1571_v18 = vld [vmem:[%s3651_s12 + $0x178] sm:$0xff] }
 0xb81   : > { %2565 = vmatprep.subr.bf16.mxu0 %v2564_v0  ;;  %v2584_v0 = vpack.c.bf16 %v1571_v18, %v1567_v16  ;;  %2553 = vmatprep.subr.bf16.mxu1 %v2552_v17  ;;  %v1786_v16 = vld [vmem:[%s3925_s14 + $0x1a0] sm:$0xff]  ;;  %v1787_v17 = vld [vmem:[%s3925_s14 + $0x1a8] sm:$0xff] }
 0xb84   : > { %2555 = vmatpush1.bf16.msra.mxu1 %v2554_v21  ;;  %v2636_v21 = vpack.c.bf16 %v1787_v17, %v1786_v16  ;;  %v1797_v17 = vld [vmem:[%s3925_s14 + $0x1f8] sm:$0xff] }
 0xb85   : > { %2557 = vmatprep.subr.bf16.mxu1 %v2556_v28 }
 0xb88   : > { %2559 = vmatpush1.bf16.msra.mxu1 %v2558_v33  ;;  %v1772_v33 = vld [vmem:[%s3925_s14 + $0x130] sm:$0xff] }
 0xb89   : > { %2561 = vmatprep.subr.bf16.mxu1 %v2560_v40  ;;  %v1791_v40 = vld [vmem:[%s3925_s14 + $0x1c8] sm:$0xff] }
 0xb8c   : > { %2563 = vmatpush1.bf16.msra.mxu1 %v2562_v47  ;;  %v1775_v47 = vld [vmem:[%s3925_s14 + $0x148] sm:$0xff] }
 0xb8d   : > { %2597 = vmatprep.subr.bf16.mxu1 %v2596_v52 }
 0xc51   : > { %v1507_v11 = vpop.f32.mrb[2].mxu0 }
 0xc52   : > { %v3852_v12 = vadd.f32 %v1507_v11, %v3742_v39  ;;  %v2443_v13 = vpop.f32.mrb[3].mxu0  ;;  %v1526_v39 = vld [vmem:[%s3651_s12 + $0x10] sm:$0xff] }
 0xc53   : > { %v2566_v24 = vpack.c.bf16 %v1530_v22, %v1526_v39  ;;  %v1558_v11 = vld [vmem:[%s3651_s12 + $0x110] sm:$0xff] }
 0xc54   : > { %1512 = vadd.xlane.f32.xlu1 %v3852_v12  ;;  %v1566_v39 = vld [vmem:[%s3651_s12 + $0x150] sm:$0xff] }
 0xc55   : > { %2567 = vmatpush1.bf16.msra.mxu0 %v2566_v24  ;;  %v1570_v22 = vld [vmem:[%s3651_s12 + $0x170] sm:$0xff] }
 0xc56   : > { %2569 = vmatprep.subr.bf16.mxu0 %v2568_v29  ;;  %v2586_v24 = vpack.c.bf16 %v1570_v22, %v1566_v39  ;;  %v2588_v29 = vpack.c.bf16 %v1579_v27, %v1575_v26  ;;  %v1770_v39 = vld [vmem:[%s3925_s14 + $0x120] sm:$0xff]  ;;  %v1771_v22 = vld [vmem:[%s3925_s14 + $0x128] sm:$0xff]  ;;  %v1789_v26 = vld [vmem:[%s3925_s14 + $0x1b8] sm:$0xff]  ;;  %v2606_v27 = vpack.c.bf16 %v1739_v20, %v1738_v19 }
 0xc57   : > { %v2638_v28 = vpack.c.bf16 %v1771_v22, %v1770_v39 }
 0xc59   : > { %2571 = vmatpush1.bf16.msra.mxu0 %v2570_v37  ;;  %v2590_v37 = vpack.c.bf16 %v1578_v34, %v1574_v32  ;;  %v2640_v32 = vpack.c.bf16 %v1789_v26, %v1788_v25  ;;  %v1773_v34 = vld [vmem:[%s3925_s14 + $0x138] sm:$0xff] }
 0xc5a   : > { %2573 = vmatprep.subr.bf16.mxu0 %v2572_v43  ;;  %v2592_v43 = vpack.c.bf16 %v1587_v41, %v1583_v38  ;;  %v2642_v41 = vpack.c.bf16 %v1773_v34, %v1772_v33 }
 0xc5d   : > { %2575 = vmatpush1.bf16.msra.mxu0 %v2574_v51  ;;  %v1782_v51 = vld [vmem:[%s3925_s14 + $0x180] sm:$0xff] }
 0xc5e   : > { %2577 = vmatprep.subr.bf16.mxu0 %v2576_v56  ;;  %v2628_v54 = vpack.c.bf16 %v1783_v53, %v1782_v51  ;;  %v1793_v51 = vld [vmem:[%s3925_s14 + $0x1d8] sm:$0xff]  ;;  %v2646_v53 = vpack.c.bf16 %v1775_v47, %v1774_v46 }
 0xc61   : > { %2579 = vmatpush1.bf16.msra.mxu0 %v2578_v60  ;;  %v1766_v60 = vld [vmem:[%s3925_s14 + $0x100] sm:$0xff] }
 0xc62   : > { %2581 = vmatprep.subr.bf16.mxu0 %v2580_v9 }
 0xce1   : > { %v1513_v61 = vpop.xlane.xlu1 %1512 }
 0xce2   : > { %v1515_v62 = vmul.f32 0.0078125, %v1513_v61  ;;  %v1767_v61 = vld [vmem:[%s3925_s14 + $0x108] sm:$0xff] }
 0xce3   : > { %v2630_v6 = vpack.c.bf16 %v1767_v61, %v1766_v60  ;;  %v1762_v60 = vld [vmem:[%s3925_s14 + $0xe0] sm:$0xff]  ;;  %v1763_v61 = vld [vmem:[%s3925_s14 + $0xe8] sm:$0xff] }
 0xce4   : > { %v3888_v63 = vsub.f32 %v3852_v12, %v1515_v62  ;;  %v1562_v12 = vld [vmem:[%s3651_s12 + $0x130] sm:$0xff]  ;;  %s4205_s12 = sld [smem:[#allocation45_spill]] }
 0xce5   : > { %v2582_v13 = vpack.c.bf16 %v1562_v12, %v1558_v11  ;;  %v1752_v62 = vld [vmem:[%s3925_s14 + $0x90] sm:$0xff]  ;;  %v2632_v11 = vpack.c.bf16 %v1785_v3, %v1784_v2  ;;  %v2650_v3 = vpack.c.bf16 %v1777_v59, %v1776_v58 }
 0xce6   : > { %v1517_v1 = vmul.f32 %v3888_v63, %v3888_v63  ;;  %v1768_v12 = vld [vmem:[%s3925_s14 + $0x110] sm:$0xff] }
 0xce7   : > { %2583 = vmatpush1.bf16.msra.mxu0 %v2582_v13  ;;  %v1769_v13 = vld [vmem:[%s3925_s14 + $0x118] sm:$0xff] }
 0xce8   : > { %1518 = vadd.xlane.f32.xlu0 %v1517_v1  ;;  %2585 = vmatprep.subr.bf16.mxu0 %v2584_v0  ;;  %v1753_v1 = vld [vmem:[%s3925_s14 + $0x98] sm:$0xff]  ;;  %v2634_v18 = vpack.c.bf16 %v1769_v13, %v1768_v12  ;;  %v2604_v0 = vpack.c.bf16 %v1755_v15, %v1754_v14  ;;  %v1764_v13 = vld [vmem:[%s3925_s14 + $0xf0] sm:$0xff] }
 0xce9   : > { %v2600_v10 = vpack.c.bf16 %v1753_v1, %v1752_v62  ;;  %v1794_v62 = vld [vmem:[%s3925_s14 + $0x1e0] sm:$0xff]  ;;  %v1795_v1 = vld [vmem:[%s3925_s14 + $0x1e8] sm:$0xff]  ;;  %v1765_v14 = vld [vmem:[%s3925_s14 + $0xf8] sm:$0xff] }
 0xcea   : > { %v1796_v15 = vld [vmem:[%s3925_s14 + $0x1f0] sm:$0xff]  ;;  %v2624_v16 = vpack.c.bf16 %v1765_v14, %v1764_v13  ;;  %s4005_s9 = scalar_lea.hbm %s4205_s12, %s2259_s2 }
 0xceb   : > { %2587 = vmatpush1.bf16.msra.mxu0 %v2586_v24  ;;  %v1757_v24 = vld [vmem:[%s3925_s14 + $0xb8] sm:$0xff]  ;;  %v2656_v19 = vpack.c.bf16 %v1797_v17, %v1796_v15 }
 0xcec   : > { %2589 = vmatprep.subr.bf16.mxu0 %v2588_v29  ;;  %v1740_v29 = vld [vmem:[%s3925_s14 + $0x30] sm:$0xff]  ;;  %v2608_v31 = vpack.c.bf16 %v1757_v24, %v1756_v23 }
 0xced   : > { %v2610_v38 = vpack.c.bf16 %v1741_v30, %v1740_v29 }
 0xcef   : > { %2591 = vmatpush1.bf16.msra.mxu0 %v2590_v37  ;;  %v1790_v37 = vld [vmem:[%s3925_s14 + $0x1c0] sm:$0xff] }
 0xcf0   : > { %2593 = vmatprep.subr.bf16.mxu0 %v2592_v43  ;;  %v1743_v43 = vld [vmem:[%s3925_s14 + $0x48] sm:$0xff]  ;;  %v2644_v45 = vpack.c.bf16 %v1791_v40, %v1790_v37 }
 0xcf1   : > { %v2614_v52 = vpack.c.bf16 %v1743_v43, %v1742_v42 }
 0xcf3   : > { %2595 = vmatpush1.bf16.msra.mxu0 %v2594_v48  ;;  %v1760_v48 = vld [vmem:[%s3925_s14 + $0xd0] sm:$0xff] }
 0xcf4   : > { %2629 = vmatprep.subr.bf16.mxu0 %v2628_v54  ;;  %v1744_v54 = vld [vmem:[%s3925_s14 + $0x50] sm:$0xff] }
 0xd75   : > { %v1519_v55 = vpop.xlane.xlu0 %1518 }
 0xd76   : > { %v1520_v56 = vmul.f32 0.0078125, %v1519_v55  ;;  %v1745_v55 = vld [vmem:[%s3925_s14 + $0x58] sm:$0xff] }
 0xd77   : > { %v2618_v2 = vpack.c.bf16 %v1745_v55, %v1744_v54 }
 0xd78   : > { %v1521_v57 = vadd.f32 1e-05, %v1520_v56  ;;  %v2616_v56 = vpack.c.bf16 %v1761_v49, %v1760_v48 }
 0xd7a   : > { %2840 = vrsqrt.f32 %v1521_v57  ;;  %v2648_v57 = vpack.c.bf16 %v1793_v51, %v1792_v50 }
 0xd84   : > { %v2841_v4 = vpop.eup %2840 }
 0xd85   : > { %v3942_v9 = vmul.f32 %v2841_v4, %v3888_v63  ;;  %v2602_v63 = vpack.c.bf16 %v1737_v8, %v1736_v7  ;;  %v1746_v4 = vld [vmem:[%s3925_s14 + $0x60] sm:$0xff]  ;;  %v1747_v7 = vld [vmem:[%s3925_s14 + $0x68] sm:$0xff] }
 0xd86   : > { %v1778_v8 = vld [vmem:[%s3925_s14 + $0x160] sm:$0xff] }
 0xd87   : > { %1653 = vmatmul.mubr.f32.vlgmr.msra.gmra.mrb[18].mxu1 %v3942_v9  ;;  %1724 = vmatmul.mubr.f32.vlgmr.msra.gmra.mrb[4].mxu0 %v3942_v9 }
 0xd88   : > { %2599 = vmatpush3.bf16.msra.mxu1 %v2598_v5  ;;  %2631 = vmatpush3.bf16.msra.mxu0 %v2630_v6  ;;  %v2620_v5 = vpack.c.bf16 %v1763_v61, %v1762_v60  ;;  %v2652_v6 = vpack.c.bf16 %v1795_v1, %v1794_v62 }
 0xd89   : > { %2601 = vmatprep.subr.bf16.mxu1 %v2600_v10  ;;  %2633 = vmatprep.subr.bf16.mxu0 %v2632_v11  ;;  %v1779_v10 = vld [vmem:[%s3925_s14 + $0x168] sm:$0xff]  ;;  %v2622_v11 = vpack.c.bf16 %v1747_v7, %v1746_v4 }
 0xd8a   : > { %v2654_v12 = vpack.c.bf16 %v1779_v10, %v1778_v8 }
 0xd8c   : > { %2603 = vmatpush3.bf16.msra.mxu1 %v2602_v63  ;;  %2635 = vmatpush3.bf16.msra.mxu0 %v2634_v18  ;;  %v1748_v63 = vld [vmem:[%s3925_s14 + $0x70] sm:$0xff]  ;;  %v1749_v18 = vld [vmem:[%s3925_s14 + $0x78] sm:$0xff] }
 0xd8d   : > { %2605 = vmatprep.subr.bf16.mxu1 %v2604_v0  ;;  %2637 = vmatprep.subr.bf16.mxu0 %v2636_v21  ;;  %v2626_v20 = vpack.c.bf16 %v1749_v18, %v1748_v63  ;;  %v1780_v0 = vld [vmem:[%s3925_s14 + $0x170] sm:$0xff]  ;;  %v1781_v21 = vld [vmem:[%s3925_s14 + $0x178] sm:$0xff] }
 0xd8e   : > { %v2658_v39 = vpack.c.bf16 %v1781_v21, %v1780_v0 }
 0xd90   : > { %2607 = vmatpush3.bf16.msra.mxu1 %v2606_v27  ;;  %2639 = vmatpush3.bf16.msra.mxu0 %v2638_v28 }
 0xd91   : > { %2609 = vmatprep.subr.bf16.mxu1 %v2608_v31  ;;  %2641 = vmatprep.subr.bf16.mxu0 %v2640_v32 }
 0xd94   : > { %2611 = vmatpush3.bf16.msra.mxu1 %v2610_v38  ;;  %2643 = vmatpush3.bf16.msra.mxu0 %v2642_v41 }
 0xd95   : > { %2613 = vmatprep.subr.bf16.mxu1 %v2612_v44  ;;  %2645 = vmatprep.subr.bf16.mxu0 %v2644_v45 }
 0xd98   : > { %2615 = vmatpush3.bf16.msra.mxu1 %v2614_v52  ;;  %2647 = vmatpush3.bf16.msra.mxu0 %v2646_v53 }
 0xd99   : > { %2617 = vmatprep.subr.bf16.mxu1 %v2616_v56  ;;  %2649 = vmatprep.subr.bf16.mxu0 %v2648_v57 }
 0xd9c   : > { %2619 = vmatpush3.bf16.msra.mxu1 %v2618_v2  ;;  %2651 = vmatpush3.bf16.msra.mxu0 %v2650_v3 }
 0xd9d   : > { %2621 = vmatprep.subr.bf16.mxu1 %v2620_v5  ;;  %2653 = vmatprep.subr.bf16.mxu0 %v2652_v6 }
 0xda0   : > { %2623 = vmatpush3.bf16.msra.mxu1 %v2622_v11  ;;  %2655 = vmatpush3.bf16.msra.mxu0 %v2654_v12 }
 0xda1   : > { %2625 = vmatprep.subr.bf16.mxu1 %v2624_v16  ;;  %2657 = vmatprep.subr.bf16.mxu0 %v2656_v19 }
 0xda4   : > { %2627 = vmatpush3.bf16.msra.mxu1 %v2626_v20  ;;  %2659 = vmatpush3.bf16.msra.mxu0 %v2658_v39 }
 0xe5a   : > { %v1654_v22 = vpop.f32.mrb[18].mxu1  ;;  %v1725_v23 = vpop.f32.mrb[4].mxu0 }
 0xe5b   : > { %v1656_v24 = vpop.f32.mrb[19].mxu1  ;;  %v1727_v25 = vpop.f32.mrb[5].mxu0  ;;  %v1730_v28 = vmax.f32 %v1654_v22, 0.0  ;;  %v1732_v29 = vmax.f32 %v1725_v23, 0.0 }
 0xe5c   : > { %v1731_v26 = vmax.f32 %v1656_v24, 0.0  ;;  %v1733_v27 = vmax.f32 %v1727_v25, 0.0 }
 0xe5e   : > { %1862 = vmatprep.mubr.f32.mxu1 %v1731_v26  ;;  %1932 = vmatprep.mubr.f32.mxu0 %v1733_v27 }
 0xe5f   : > { %1863 = vmatmul.mubr.f32.vlgmr.msra.gmra.mrb[20].mxu1 %v1730_v28  ;;  %1933 = vmatmul.mubr.f32.vlgmr.msra.gmra.mrb[6].mxu0 %v1732_v29 }
 0xf32   : > { %v2331_v30 = vpop.f32.mrb[20].mxu1  ;;  %v2366_v31 = vpop.f32.mrb[6].mxu0 }
 0xf33   : > { %v2332_v32 = vpop.f32.mrb[21].mxu1  ;;  %v2367_v33 = vpop.f32.mrb[7].mxu0 }
 0xf34   : > { %v2333_v34 = vadd.f32 %v2332_v32, %v2331_v30  ;;  %v2368_v35 = vadd.f32 %v2367_v33, %v2366_v31 }
 0xf36   : > { %v1865_v36 = vadd.f32 %v2333_v34, %v3942_v9 }
 0xf38   : > { %v1935_v37 = vadd.f32 %v2368_v35, %v1865_v36 }
 0xf3a   : > { %1938 = vadd.xlane.f32.xlu1 %v1935_v37 }
 0xfc7   : > { %v1939_v40 = vpop.xlane.xlu1 %1938 }
 0xfc8   : > { %v1940_v38 = vmul.f32 0.0078125, %v1939_v40 }
 0xfca   : > { %v1941_v41 = vsub.f32 %v1935_v37, %v1940_v38 }
 0xfcc   : > { %v1942_v42 = vmul.f32 %v1941_v41, %v1941_v41 }
 0xfce   : > { %1943 = vadd.xlane.f32.xlu1 %v1942_v42 }
 0xfcf   : > { %3017 = shalt.err (!%p3014_p8)
}
 0xfd0   : > { %s3018_s26 = scalar_lea.hbm %s4005_s9, 512  ;;  %s3022_s28 = scalar_lea.hbm %s4205_s12, 2048 }
 0xfd1   : > { %p3019_p1 = scmp.ne.s32.totalorder %s4005_s9, %s3018_s26  ;;  %p3023_p4 = scmp.lt.u32.totalorder %s4005_s9, %s4205_s12 }
 0xfd2   : > { %p3024_p0 = scmp.lt.u32.totalorder %s3022_s28, %s3018_s26  ;;  %p3026_p13 = scmp.lt.u32.totalorder %s3018_s26, %s4005_s9 }
 0xfd3   : > { %p3020_p11 = pnand %p3019_p1, %p4206_p3 }
 0xfd4   : > { %p3025_p12 = por %p3024_p0, %p3023_p4 }
 0xfd5   : > { %p3021_p9 = pneg %p3020_p11 }
 0xfd6   : > { %p3027_p5 = por %p3026_p13, %p3025_p12 }
 0xfd8   : > { %p3028_p6 = pnand %p3027_p5, %p3021_p9 }
 0xfda   : > { %3031 = shalt.err (!%p3028_p6)
}
 0xfdb   : > { %s3211_s19 = smov 128   ;;  %s3212_s18 = smov 8  }
 0xfdc   : > { %2671 = dma.vmem_to_hbm [thread:$0]  (%p4206_p3), %s4000_s20, 512, %s4005_s9, %s1956_s23, %s3211_s19, %s3211_s19, %s3212_s18  }
 0xfdd   : > { %s2235_s25 = sshll.u32 %s3766_s21, 3  ;;  %s2255_s2 = sshll.u32 %s4202_s29, 1 }
 0xfde   : > { %s1968_s7 = sadd.s32 %s4203_s30, %s2255_s2  ;;  %s494_s5 = scalar_lea.vmem [#allocation15], %s2235_s25 }
 0xfdf   : > { %s2256_s8 = sshll.u32 %s1968_s7, 7  ;;  %s1972_s6 = sshll.u32 %s494_s5, 4  ;;  %s4039_s6 = int_to_ptr.vmem [resolvable:$true] %s1972_s6 }
 0xfe0   : > { %s4207_s26 = sld [smem:[#allocation44_spill]]  ;;  %s1951_s20 = scalar_lea.sflag [#allocation8], %s3766_s21 }
 0xfe1   : > { %s3032_s9 = scalar_lea.vmem %s4039_s6, 128  ;;  %s3213_s29 = smov [#allocation15]  }
 0xfe2   : > { %p3033_p7 = scmp.ne.s32.totalorder %s4039_s6, %s3032_s9  ;;  %s3036_s30 = sshll.u32 %s3213_s29, 4  ;;  %s3037_s30 = int_to_ptr.vmem [resolvable:$false] %s3036_s30 }
 0xfe3   : > { %s3038_s23 = scalar_lea.vmem %s3037_s30, 256  ;;  %p3039_p8 = scmp.lt.s32.totalorder %s4039_s6, %s3037_s30 }
 0xfe4   : > { %p3034_p10 = pnand %p3033_p7, %p4206_p3  ;;  %p3040_p1 = scmp.lt.s32.totalorder %s3038_s23, %s3032_s9 }
 0xfe6   : > { %s4208_s3 = smov %s4207_s26  ;;  %s4037_s0 = scalar_lea.hbm %s4207_s26, %s2256_s8 }
 0xfe7   : > { %p3035_p2 = pneg %p3034_p10  ;;  %p3041_p11 = por %p3040_p1, %p3039_p8 }
 0xfe9   : > { %p3042_p9 = pnand %p3041_p11, %p3035_p2 }
0x105b   : > { %v1944_v9 = vpop.xlane.xlu1 %1943 }
0x105c   : > { %v1945_v43 = vmul.f32 0.0078125, %v1944_v9 }
0x105e   : > { %v1946_v44 = vadd.f32 1e-05, %v1945_v43 }
0x1060   : > { %2842 = vrsqrt.f32 %v1946_v44 }
0x106a   : > { %v2843_v45 = vpop.eup %2842 }
0x106b   : > { %v1948_v46 = vmul.f32 %v2843_v45, %v1941_v41 }
0x106d   : > { %1949 = vst [vmem:[%s494_s5] sm:$0xff] %v1948_v46 }
0x106e   : > { %3045 = shalt.err (!%p3042_p9)
}
0x106f   : > { %s3046_s21 = scalar_lea.hbm %s4037_s0, 128  ;;  %s3050_s14 = scalar_lea.hbm %s4208_s3, 512 }
0x1070   : > { %p3047_p4 = scmp.ne.s32.totalorder %s4037_s0, %s3046_s21  ;;  %p3051_p13 = scmp.lt.u32.totalorder %s4037_s0, %s4208_s3 }
0x1071   : > { %p3052_p5 = scmp.lt.u32.totalorder %s3050_s14, %s3046_s21  ;;  %p3054_p7 = scmp.lt.u32.totalorder %s3046_s21, %s4037_s0 }
0x1072   : > { %p3048_p0 = pnand %p3047_p4, %p4206_p3 }
0x1073   : > { %p3053_p6 = por %p3052_p5, %p3051_p13 }
0x1074   : > { %p3049_p12 = pneg %p3048_p0 }
0x1075   : > { %p3055_p10 = por %p3054_p7, %p3053_p6 }
0x1077   : > { %p3056_p2 = pnand %p3055_p10, %p3049_p12 }
0x1079   : > { %3059 = shalt.err (!%p3056_p2)
}
0x107a   : > { %2670 = dma.vmem_to_hbm [thread:$0]  (%p4206_p3), %s4039_s6, 128, %s4037_s0, %s1951_s20  }
0x107b PF: > { %p2698_p8 = scmp.ge.s32.totalorder %s3192_s27, 2  ;;  %s2003_s25 = sand.u32 1, %s3140_s15  }
0x107c   : > { %p4209_p1 = scmp.ne.s32.totalorder %s4188_s10, 0  ;;  %s2004_s2 = scalar_lea.sflag [#allocation8], %s2003_s25 }
0x107e   : > { %p2691_p11 = pnand %p2698_p8, %p4209_p1 }
0x1080   : > { %3131 = dma.done.wait (!%p2691_p11), %s2004_s2, 128  }
0x1081   : > { %3133 = vsyncadd (!%p2691_p11), %s2004_s2, 4294967168  ;;  %s2013_s7 = scalar_lea.sflag [#allocation17], %s2003_s25 }
0x1082   : > { %3135 = dma.done.wait (!%p2691_p11), %s2013_s7, 512  }
0x1083   : > { %3137 = vsyncadd (!%p2691_p11), %s2013_s7, 4294966784  ;;  %s38_s27 = sadd.s32 1, %s3192_s27   ;;  %s4211_s8 = sld [smem:[#allocation24_spill]] }
0x1084   : > { %p4068_p9 = scmp.ge.s32.totalorder %s38_s27, 6   ;;  %s4212_s17 = sld [smem:[#allocation39_spill]] }
0x1085   : > { %s4213_s0 = sld [smem:[#allocation25_spill]]  ;;  %s4214_s18 = sld [smem:[#allocation26_spill]] }
0x1086   : > { %s4215_s19 = sld [smem:[#allocation37_spill]]  ;;  %s4216_s20 = sld [smem:[#allocation27_spill]] }
0x1087   : > { %s4217_s21 = sld [smem:[#allocation28_spill]]  ;;  %s4218_s22 = sld [smem:[#allocation36_spill]] }
0x1088   : > { %s4219_s23 = sld [smem:[#allocation31_spill]]  ;;  %s4220_s10 = sld [smem:[#allocation32_spill]] }
0x1089   : > { %s4221_s25 = sld [smem:[#allocation34_spill]]  ;;  %s4222_s26 = sld [smem:[#allocation35_spill]] }
0x108a   : > { %s4224_s15 = smov %s3144_s16  ;;  %s4225_s16 = smov %s4211_s8 }
0x108b   :  { %37 = sbr.rel (!%p4068_p9) target bundleno = 29 (0x1d), region = 165 }
0x108e   : > { %s4226_s24 = smov %s4220_s10 }
0x1092   :  { %2018 = vsyncpa [#allocation7], 1 }
0x1093   :  { %2020 = vsyncpa [#allocation7 + $0x1], 1 }
0x1094   :  { %2021 = vsyncpa [#allocation10], 1 }
0x1095   :  { %2023 = vsyncpa [#allocation10 + $0x1], 1 }
0x1096   :  { %2024 = vsyncpa [#allocation13], 1 }
0x1097   :  { %2026 = vsyncpa [#allocation13 + $0x1], 1 }
0x1098   :  { %2027 = vsyncpa [#allocation8], 1 }
0x1099   :  { %2029 = vsyncpa [#allocation8 + $0x1], 1 }
0x109a   :  { %2030 = vsyncpa [#allocation17], 1 }
0x109b   :  { %2032 = vsyncpa [#allocation17 + $0x1], 1 }

</bundles_post_ra>
